<compile_context>
chip_gen: v5e
topology: v5e:2x2
jax: 0.10.0
libtpu: 0.0.40
codegen_flags: <defaults>
</compile_context>

<pallas_src>
from functools import partial

import numpy as np
import jax
import jax.numpy as jnp
from jax import lax
from jax.experimental import pallas as pl
from jax.experimental.pallas import tpu as pltpu

# Small, module-consistent problem sizes.
D_HIDDEN = 32        # d_hidden (kept small)
HIDDEN = 768         # hidden width hard-coded to 768 in the PyTorch module
NUM_CLASS = 4        # num_of_class
K = 0.4              # top-k fraction
BATCH = 2
NUM_SPANS = 8        # number of spans per example
LANE = 128           # lane-dense padding of the class axis


# ----------------------------------------------------------------------------
# Pallas kernels
# ----------------------------------------------------------------------------
def _span_mlp_kernel(x_ref, w1_ref, b1_ref, w2_ref, b2_ref, o_ref):
    """span_scorer: Linear(D, H) -> ReLU -> Linear(H, C[pad 128]) on all B*S rows."""
    x = x_ref[...].astype(jnp.bfloat16)                                   # (BS, D)
    h = jnp.dot(x, w1_ref[...], preferred_element_type=jnp.float32) + b1_ref[...]
    h = jnp.maximum(h, 0.0)                                               # f32 ReLU (v5e-safe)
    o_ref[...] = (jnp.dot(h.astype(jnp.bfloat16), w2_ref[...],
                          preferred_element_type=jnp.float32)
                  + b2_ref[...]).astype(o_ref.dtype)                      # (BS, 128) lane-dense


def _pair_sum_kernel(gi_ref, gj_ref, x_ref, h_ref,
                     w1_ref, b1_ref, w2_ref, b2_ref, o_ref):
    """Fused pair path for ALL batches in one grid step.

    gi/gj are flattened global row indices (b*S + idx[b, p//N] / p%N), -1 for
    padding rows.  One-hot selection matrices are generated in-kernel with an
    iota compare (no HBM selector arrays).  The pair_scorer MLP runs as one
    K=128 bf16 matmul chain; the span-logit sum is a single merged f32 gather.
    """
    BP = gi_ref.shape[0]                   # B * P_pad pair rows
    BS, D = x_ref.shape                    # B * S span rows, d_hidden

    col = lax.broadcasted_iota(jnp.int32, (BP, BS), 1)
    mi = col == gi_ref[...]                # (BP, BS) one-hot of row i
    mj = col == gj_ref[...]                # (BP, BS) one-hot of row j
    gi_b = mi.astype(jnp.bfloat16)
    gj_b = mj.astype(jnp.bfloat16)
    gs_f = mi.astype(jnp.float32) + mj.astype(jnp.float32)   # merged ri+rj (diag -> 2)

    # Gather x_i, x_j (bf16 one-hot matmuls; values feed bf16 MXU ops next).
    x_b = x_ref[...].astype(jnp.bfloat16)                                 # (BS, D)
    xi = jnp.dot(gi_b, x_b, preferred_element_type=jnp.float32)           # (BP, D)
    xj = jnp.dot(gj_b, x_b, preferred_element_type=jnp.float32)           # (BP, D)
    prod = xi * xj                                                        # x_i * x_j (f32 VPU)

    # Fused pair features: [x_i | x_j | x_i*x_j | 0-pad] -> (BP, 128) bf16.
    pad = w1_ref.shape[0] - 3 * D
    parts = [xi.astype(jnp.bfloat16), xj.astype(jnp.bfloat16), prod.astype(jnp.bfloat16)]
    if pad > 0:
        parts.append(jnp.zeros((BP, pad), jnp.bfloat16))
    pairs = jnp.concatenate(parts, axis=-1)                               # (BP, KIN)

    # pair_scorer: Linear(3D, H) -> ReLU -> Linear(H, C[pad 128]), one matmul each.
    hdn = jnp.dot(pairs, w1_ref[...], preferred_element_type=jnp.float32) + b1_ref[...]
    hdn = jnp.maximum(hdn, 0.0)                                           # f32 ReLU
    pair_logits = (jnp.dot(hdn.astype(jnp.bfloat16), w2_ref[...],
                           preferred_element_type=jnp.float32) + b2_ref[...])  # (BP, 128)

    # summed_logits[p] = pair[p] + span_logits[i] + span_logits[j]  (exact f32 gather-add)
    span_sum = jnp.dot(gs_f, h_ref[...], preferred_element_type=jnp.float32)   # (BP, 128)

    o_ref[...] = (pair_logits + span_sum).astype(o_ref.dtype)             # single unmasked store


# ----------------------------------------------------------------------------
# pallas_call wrappers (single grid step each; weights fetched once)
# ----------------------------------------------------------------------------
def span_mlp_forward(x_flat, w1, b1, w2p, b2p):
    R, D = x_flat.shape
    H = w1.shape[1]
    CP = w2p.shape[1]
    return pl.pallas_call(
        _span_mlp_kernel,
        grid=(1,),
        out_shape=jax.ShapeDtypeStruct((R, CP), jnp.float32),
        in_specs=[
            pl.BlockSpec((R, D), lambda i: (0, 0)),
            pl.BlockSpec((D, H), lambda i: (0, 0)),
            pl.BlockSpec((1, H), lambda i: (0, 0)),
            pl.BlockSpec((H, CP), lambda i: (0, 0)),
            pl.BlockSpec((1, CP), lambda i: (0, 0)),
        ],
        out_specs=pl.BlockSpec((R, CP), lambda i: (0, 0)),
        compiler_params=pltpu.CompilerParams(dimension_semantics=("arbitrary",)),
    )(x_flat, w1, b1, w2p, b2p)


def pair_and_sum_forward(gi, gj, x_flat, h_flat, w1, b1, w2, b2):
    BP = gi.shape[0]
    BS, D = x_flat.shape
    CP = h_flat.shape[1]
    KIN, H = w1.shape
    return pl.pallas_call(
        _pair_sum_kernel,
        grid=(1,),
        out_shape=jax.ShapeDtypeStruct((BP, CP), jnp.float32),
        in_specs=[
            pl.BlockSpec((BP, 1), lambda i: (0, 0)),
            pl.BlockSpec((BP, 1), lambda i: (0, 0)),
            pl.BlockSpec((BS, D), lambda i: (0, 0)),
            pl.BlockSpec((BS, CP), lambda i: (0, 0)),
            pl.BlockSpec((KIN, H), lambda i: (0, 0)),
            pl.BlockSpec((1, H), lambda i: (0, 0)),
            pl.BlockSpec((H, CP), lambda i: (0, 0)),
            pl.BlockSpec((1, CP), lambda i: (0, 0)),
        ],
        out_specs=pl.BlockSpec((BP, CP), lambda i: (0, 0)),
        compiler_params=pltpu.CompilerParams(dimension_semantics=("arbitrary",)),
    )(gi, gj, x_flat, h_flat, w1, b1, w2, b2)


# ----------------------------------------------------------------------------
# Parameter setup / preparation
# ----------------------------------------------------------------------------
def init_params(key, d_hidden=D_HIDDEN, hidden=HIDDEN, num_class=NUM_CLASS):
    ks = jax.random.split(key, 8)
    scale = 0.02
    span = (
        jax.random.normal(ks[0], (d_hidden, hidden), jnp.float32) * scale,
        jax.random.normal(ks[1], (hidden,), jnp.float32) * scale,
        jax.random.normal(ks[2], (hidden, num_class), jnp.float32) * scale,
        jax.random.normal(ks[3], (num_class,), jnp.float32) * scale,
    )
    pair = (
        jax.random.normal(ks[4], (3 * d_hidden, hidden), jnp.float32) * scale,
        jax.random.normal(ks[5], (hidden,), jnp.float32) * scale,
        jax.random.normal(ks[6], (hidden, num_class), jnp.float32) * scale,
        jax.random.normal(ks[7], (num_class,), jnp.float32) * scale,
    )
    return {"span": span, "pair": pair}


def prepare_params(params, lane=LANE):
    """bf16 MXU weights; class axis zero-padded to 128 lanes; fused pair W1 padded to 128 rows."""
    sw1, sb1, sw2, sb2 = params["span"]
    pw1, pb1, pw2, pb2 = params["pair"]
    d3 = pw1.shape[0]
    pair_in_pad = int(np.ceil(d3 / lane)) * lane

    def pad_cols(w):
        return jnp.pad(w, ((0, 0), (0, lane - w.shape[1])))

    return {
        "span_w1": sw1.astype(jnp.bfloat16),
        "span_b1": sb1.reshape(1, -1).astype(jnp.float32),
        "span_w2": pad_cols(sw2).astype(jnp.bfloat16),
        "span_b2": pad_cols(sb2.reshape(1, -1)).astype(jnp.float32),
        # Fused (unsplit) pair W1: rows [x_i | x_j | x_i*x_j | zero-pad] -> (128, H).
        "pair_w1": jnp.pad(pw1, ((0, pair_in_pad - d3), (0, 0))).astype(jnp.bfloat16),
        "pair_b1": pb1.reshape(1, -1).astype(jnp.float32),
        "pair_w2": pad_cols(pw2).astype(jnp.bfloat16),
        "pair_b2": pad_cols(pb2.reshape(1, -1)).astype(jnp.float32),
    }


# ----------------------------------------------------------------------------
# Device-side forward (jitted): 2 pallas_calls + tiny XLA top-k glue
# ----------------------------------------------------------------------------
@partial(jax.jit, static_argnames=("n_keep", "p_pad", "k_frac", "num_class"))
def _device_forward(x, prep, n_keep, p_pad, k_frac, num_class):
    B, S, D = x.shape
    x_flat = x.reshape(B * S, D)

    # h = self.span_scorer(x)   (torch.no_grad branch), all B*S rows in one kernel.
    h_flat = span_mlp_forward(x_flat, prep["span_w1"], prep["span_b1"],
                              prep["span_w2"], prep["span_b2"])           # (B*S, 128)
    CP = h_flat.shape[1]
    h = h_flat.reshape(B, S, CP)

    # get_top_k_percent_spans — faithful to the PyTorch rule: mean over classes
    # [1,2,3], descending argsort, keep rank-positions j where the argsort VALUE
    # at j is < k*S (positions stay in ascending order).  Tiny; stays in XLA.
    h_mean = h[:, :, 1:4].mean(axis=-1)
    order = jnp.argsort(-h_mean, axis=-1)
    keep = order.astype(jnp.float32) < jnp.float32(k_frac * S)
    sort_key = jnp.where(keep, jnp.arange(S, dtype=jnp.int32)[None, :], jnp.int32(S))
    idx = jnp.sort(sort_key, axis=-1)[:, :n_keep]                         # (B, N) ascending j

    # Flattened global gather indices for the pair kernel (no take_along_axis
    # on x / h — the pair kernel gathers from the full tensors in-kernel).
    P = n_keep * n_keep
    p_ids = jnp.arange(p_pad)
    valid = (p_ids < P)[None, :]
    i_of_p = jnp.clip(p_ids // n_keep, 0, n_keep - 1)
    j_of_p = jnp.clip(p_ids % n_keep, 0, n_keep - 1)
    base = (jnp.arange(B, dtype=jnp.int32) * S)[:, None]
    gi = jnp.where(valid, base + idx[:, i_of_p], -1).astype(jnp.int32).reshape(B * p_pad, 1)
    gj = jnp.where(valid, base + idx[:, j_of_p], -1).astype(jnp.int32).reshape(B * p_pad, 1)

    # TODO(synk): nn.Dropout(0.1) is modeled in eval mode (identity), so the second
    # span_scorer pass equals gathering rows of the already-computed h (done in-kernel).
    summed = pair_and_sum_forward(gi, gj, x_flat, h_flat,
                                  prep["pair_w1"], prep["pair_b1"],
                                  prep["pair_w2"], prep["pair_b2"])       # (B*p_pad, 128)

    logits = summed.reshape(B, p_pad, CP)[:, :P, :num_class]
    return logits, idx


# ----------------------------------------------------------------------------
# Full forward reproducing RelationScorer.forward
# ----------------------------------------------------------------------------
def relation_scorer_forward(x, span_ranges, params, k=K):
    B, S, D = x.shape
    # Number of kept rank-positions is static: #{v in 0..S-1 : v < k*S}.
    n_keep = int(np.sum(np.arange(S) < k * S))
    P = n_keep * n_keep
    p_pad = max(8, ((P + 7) // 8) * 8)          # sublane-dense pair-row count
    prep = prepare_params(params)

    logits, idx = _device_forward(x, prep, n_keep=n_keep, p_pad=p_pad,
                                  k_frac=float(k), num_class=NUM_CLASS)

    # Host-side metadata (Python lists, as the PyTorch module returns).  Only the
    # tiny (B, N) index array crosses to host, after the kernels were dispatched.
    idx_host = np.asarray(idx)
    span_pair_ranges = []
    for b in range(B):
        ranked = [span_ranges[int(j)] for j in idx_host[b]]
        span_pair_ranges.append([(ranked[i], ranked[j])
                                 for i in range(n_keep) for j in range(n_keep)])
    return logits, span_pair_ranges


if __name__ == "__main__":
    key = jax.random.PRNGKey(0)
    kx, kp = jax.random.split(key)
    x = jax.random.normal(kx, (BATCH, NUM_SPANS, D_HIDDEN), jnp.float32)
    span_ranges = [(j, j + 2) for j in range(NUM_SPANS)]   # one (start, end) per span
    params = init_params(kp)

    logits_relation_scorer, span_pair_ranges = relation_scorer_forward(x, span_ranges, params, k=K)
    jax.block_until_ready(logits_relation_scorer)

    n_keep = int(np.sum(np.arange(NUM_SPANS) < K * NUM_SPANS))
    n_pairs = len(span_pair_ranges[0])
    assert n_pairs == n_keep * n_keep
    assert logits_relation_scorer.shape == (BATCH, n_pairs, NUM_CLASS)
    print("KERNEL_OK")
</pallas_src>

<mosaic_0001>
module attributes {stable_mosaic.version = 11 : i64} {
  func.func @_span_mlp_kernel(%arg0: i32, %arg1: memref<16x32xf32, #tpu.memory_space<vmem>>, %arg2: memref<32x768xbf16, #tpu.memory_space<vmem>>, %arg3: memref<1x768xf32, #tpu.memory_space<vmem>>, %arg4: memref<768x128xbf16, #tpu.memory_space<vmem>>, %arg5: memref<1x128xf32, #tpu.memory_space<vmem>>, %arg6: memref<16x128xf32, #tpu.memory_space<vmem>>) attributes {dimension_semantics = [#tpu.dimension_semantics<arbitrary>], iteration_bounds = array<i64: 1>, scalar_prefetch = 0 : i64, scratch_operands = 0 : i64, tpu.core_type = #tpu.core_type<tc>, window_params = [{pipeline_mode = #tpu.pipeline_mode<synchronous>, transform_indices = @transform_0, window_bounds = array<i64: 16, 32>}, {pipeline_mode = #tpu.pipeline_mode<synchronous>, transform_indices = @transform_1, window_bounds = array<i64: 32, 768>}, {pipeline_mode = #tpu.pipeline_mode<synchronous>, transform_indices = @transform_2, window_bounds = array<i64: 1, 768>}, {pipeline_mode = #tpu.pipeline_mode<synchronous>, transform_indices = @transform_3, window_bounds = array<i64: 768, 128>}, {pipeline_mode = #tpu.pipeline_mode<synchronous>, transform_indices = @transform_4, window_bounds = array<i64: 1, 128>}, {pipeline_mode = #tpu.pipeline_mode<synchronous>, transform_indices = @transform_5, window_bounds = array<i64: 16, 128>}]} {
    %c0 = arith.constant 0 : index
    %c0_0 = arith.constant 0 : index
    %0 = vector.load %arg1[%c0, %c0_0] : memref<16x32xf32, #tpu.memory_space<vmem>>, vector<16x32xf32>
    %1 = arith.truncf %0 : vector<16x32xf32> to vector<16x32xbf16>
    %c0_1 = arith.constant 0 : index
    %c0_2 = arith.constant 0 : index
    %2 = vector.load %arg2[%c0_1, %c0_2] : memref<32x768xbf16, #tpu.memory_space<vmem>>, vector<32x768xbf16>
    %cst = arith.constant dense<0.000000e+00> : vector<16x768xf32>
    %3 = tpu.matmul %1, %2, %cst {dimension_numbers = #tpu.dot_dimension_numbers<[1], [0], [0], [1], [0, 0, 1, 1], [], []>} : vector<16x32xbf16>, vector<32x768xbf16>, vector<16x768xf32> -> vector<16x768xf32>
    %c0_3 = arith.constant 0 : index
    %c0_4 = arith.constant 0 : index
    %4 = vector.load %arg3[%c0_3, %c0_4] : memref<1x768xf32, #tpu.memory_space<vmem>>, vector<1x768xf32>
    %5 = vector.broadcast %4 : vector<1x768xf32> to vector<16x768xf32>
    %6 = arith.addf %3, %5 : vector<16x768xf32>
    %cst_5 = arith.constant 0.000000e+00 : f32
    %7 = vector.broadcast %cst_5 : f32 to vector<16x768xf32>
    %8 = arith.maximumf %6, %7 : vector<16x768xf32>
    %9 = arith.truncf %8 : vector<16x768xf32> to vector<16x768xbf16>
    %c0_6 = arith.constant 0 : index
    %c0_7 = arith.constant 0 : index
    %10 = vector.load %arg4[%c0_6, %c0_7] : memref<768x128xbf16, #tpu.memory_space<vmem>>, vector<768x128xbf16>
    %cst_8 = arith.constant dense<0.000000e+00> : vector<16x128xf32>
    %11 = tpu.matmul %9, %10, %cst_8 {dimension_numbers = #tpu.dot_dimension_numbers<[1], [0], [0], [1], [0, 0, 1, 1], [], []>} : vector<16x768xbf16>, vector<768x128xbf16>, vector<16x128xf32> -> vector<16x128xf32>
    %c0_9 = arith.constant 0 : index
    %c0_10 = arith.constant 0 : index
    %12 = vector.load %arg5[%c0_9, %c0_10] : memref<1x128xf32, #tpu.memory_space<vmem>>, vector<1x128xf32>
    %13 = vector.broadcast %12 : vector<1x128xf32> to vector<16x128xf32>
    %14 = arith.addf %11, %13 : vector<16x128xf32>
    %c0_11 = arith.constant 0 : index
    %c0_12 = arith.constant 0 : index
    %15 = vector.load %arg6[%c0_11, %c0_12] : memref<16x128xf32, #tpu.memory_space<vmem>>, vector<16x128xf32>
    tpu.vector_store %arg6[%c0_11, %c0_12], %14 {strides = array<i32>} : memref<16x128xf32, #tpu.memory_space<vmem>>, vector<16x128xf32>,
    return
  }
  func.func @transform_0(%arg0: i32) -> (i32, i32) {
    %c0_i32 = arith.constant 0 : i32
    %c0_i32_0 = arith.constant 0 : i32
    %c0_i32_1 = arith.constant 0 : i32
    return %c0_i32, %c0_i32_0 : i32, i32
  }
  func.func @transform_1(%arg0: i32) -> (i32, i32) {
    %c0_i32 = arith.constant 0 : i32
    %c0_i32_0 = arith.constant 0 : i32
    %c0_i32_1 = arith.constant 0 : i32
    return %c0_i32, %c0_i32_0 : i32, i32
  }
  func.func @transform_2(%arg0: i32) -> (i32, i32) {
    %c0_i32 = arith.constant 0 : i32
    %c0_i32_0 = arith.constant 0 : i32
    %c0_i32_1 = arith.constant 0 : i32
    return %c0_i32, %c0_i32_0 : i32, i32
  }
  func.func @transform_3(%arg0: i32) -> (i32, i32) {
    %c0_i32 = arith.constant 0 : i32
    %c0_i32_0 = arith.constant 0 : i32
    %c0_i32_1 = arith.constant 0 : i32
    return %c0_i32, %c0_i32_0 : i32, i32
  }
  func.func @transform_4(%arg0: i32) -> (i32, i32) {
    %c0_i32 = arith.constant 0 : i32
    %c0_i32_0 = arith.constant 0 : i32
    %c0_i32_1 = arith.constant 0 : i32
    return %c0_i32, %c0_i32_0 : i32, i32
  }
  func.func @transform_5(%arg0: i32) -> (i32, i32) {
    %c0_i32 = arith.constant 0 : i32
    %c0_i32_0 = arith.constant 0 : i32
    %c0_i32_1 = arith.constant 0 : i32
    return %c0_i32, %c0_i32_0 : i32, i32
  }
}

module attributes {stable_mosaic.version = 11 : i64} {
  func.func @_pair_sum_kernel(%arg0: i32, %arg1: memref<32x1xi32, #tpu.memory_space<vmem>>, %arg2: memref<32x1xi32, #tpu.memory_space<vmem>>, %arg3: memref<16x32xf32, #tpu.memory_space<vmem>>, %arg4: memref<16x128xf32, #tpu.memory_space<vmem>>, %arg5: memref<128x768xbf16, #tpu.memory_space<vmem>>, %arg6: memref<1x768xf32, #tpu.memory_space<vmem>>, %arg7: memref<768x128xbf16, #tpu.memory_space<vmem>>, %arg8: memref<1x128xf32, #tpu.memory_space<vmem>>, %arg9: memref<32x128xf32, #tpu.memory_space<vmem>>) attributes {dimension_semantics = [#tpu.dimension_semantics<arbitrary>], iteration_bounds = array<i64: 1>, scalar_prefetch = 0 : i64, scratch_operands = 0 : i64, tpu.core_type = #tpu.core_type<tc>, window_params = [{pipeline_mode = #tpu.pipeline_mode<synchronous>, transform_indices = @transform_0, window_bounds = array<i64: 32, 1>}, {pipeline_mode = #tpu.pipeline_mode<synchronous>, transform_indices = @transform_1, window_bounds = array<i64: 32, 1>}, {pipeline_mode = #tpu.pipeline_mode<synchronous>, transform_indices = @transform_2, window_bounds = array<i64: 16, 32>}, {pipeline_mode = #tpu.pipeline_mode<synchronous>, transform_indices = @transform_3, window_bounds = array<i64: 16, 128>}, {pipeline_mode = #tpu.pipeline_mode<synchronous>, transform_indices = @transform_4, window_bounds = array<i64: 128, 768>}, {pipeline_mode = #tpu.pipeline_mode<synchronous>, transform_indices = @transform_5, window_bounds = array<i64: 1, 768>}, {pipeline_mode = #tpu.pipeline_mode<synchronous>, transform_indices = @transform_6, window_bounds = array<i64: 768, 128>}, {pipeline_mode = #tpu.pipeline_mode<synchronous>, transform_indices = @transform_7, window_bounds = array<i64: 1, 128>}, {pipeline_mode = #tpu.pipeline_mode<synchronous>, transform_indices = @transform_8, window_bounds = array<i64: 32, 128>}]} {
    %0 = tpu.iota {dimensions = array<i32: 1>} : vector<32x16xi32>
    %c0 = arith.constant 0 : index
    %c0_0 = arith.constant 0 : index
    %1 = vector.load %arg1[%c0, %c0_0] : memref<32x1xi32, #tpu.memory_space<vmem>>, vector<32x1xi32>
    %2 = vector.broadcast %1 : vector<32x1xi32> to vector<32x16xi32>
    %3 = arith.cmpi eq, %0, %2 : vector<32x16xi32>
    %c0_1 = arith.constant 0 : index
    %c0_2 = arith.constant 0 : index
    %4 = vector.load %arg2[%c0_1, %c0_2] : memref<32x1xi32, #tpu.memory_space<vmem>>, vector<32x1xi32>
    %5 = vector.broadcast %4 : vector<32x1xi32> to vector<32x16xi32>
    %6 = arith.cmpi eq, %0, %5 : vector<32x16xi32>
    %7 = arith.extui %3 : vector<32x16xi1> to vector<32x16xi32>
    %8 = arith.sitofp %7 : vector<32x16xi32> to vector<32x16xf32>
    %9 = arith.truncf %8 : vector<32x16xf32> to vector<32x16xbf16>
    %10 = arith.extui %6 : vector<32x16xi1> to vector<32x16xi32>
    %11 = arith.sitofp %10 : vector<32x16xi32> to vector<32x16xf32>
    %12 = arith.truncf %11 : vector<32x16xf32> to vector<32x16xbf16>
    %13 = arith.extui %3 : vector<32x16xi1> to vector<32x16xi32>
    %14 = arith.sitofp %13 : vector<32x16xi32> to vector<32x16xf32>
    %15 = arith.extui %6 : vector<32x16xi1> to vector<32x16xi32>
    %16 = arith.sitofp %15 : vector<32x16xi32> to vector<32x16xf32>
    %17 = arith.addf %14, %16 : vector<32x16xf32>
    %c0_3 = arith.constant 0 : index
    %c0_4 = arith.constant 0 : index
    %18 = vector.load %arg3[%c0_3, %c0_4] : memref<16x32xf32, #tpu.memory_space<vmem>>, vector<16x32xf32>
    %19 = arith.truncf %18 : vector<16x32xf32> to vector<16x32xbf16>
    %cst = arith.constant dense<0.000000e+00> : vector<32x32xf32>
    %20 = tpu.matmul %9, %19, %cst {dimension_numbers = #tpu.dot_dimension_numbers<[1], [0], [0], [1], [0, 0, 1, 1], [], []>} : vector<32x16xbf16>, vector<16x32xbf16>, vector<32x32xf32> -> vector<32x32xf32>
    %cst_5 = arith.constant dense<0.000000e+00> : vector<32x32xf32>
    %21 = tpu.matmul %12, %19, %cst_5 {dimension_numbers = #tpu.dot_dimension_numbers<[1], [0], [0], [1], [0, 0, 1, 1], [], []>} : vector<32x16xbf16>, vector<16x32xbf16>, vector<32x32xf32> -> vector<32x32xf32>
    %22 = arith.mulf %20, %21 : vector<32x32xf32>
    %23 = arith.truncf %20 : vector<32x32xf32> to vector<32x32xbf16>
    %24 = arith.truncf %21 : vector<32x32xf32> to vector<32x32xbf16>
    %25 = arith.truncf %22 : vector<32x32xf32> to vector<32x32xbf16>
    %cst_6 = arith.constant 0.000000e+00 : bf16
    %26 = vector.broadcast %cst_6 : bf16 to vector<32x32xbf16>
    %27 = tpu.concatenate %23, %24, %25, %26 in 1 : vector<32x32xbf16>, vector<32x32xbf16>, vector<32x32xbf16>, vector<32x32xbf16> -> vector<32x128xbf16>
    %c0_7 = arith.constant 0 : index
    %c0_8 = arith.constant 0 : index
    %28 = vector.load %arg5[%c0_7, %c0_8] : memref<128x768xbf16, #tpu.memory_space<vmem>>, vector<128x768xbf16>
    %cst_9 = arith.constant dense<0.000000e+00> : vector<32x768xf32>
    %29 = tpu.matmul %27, %28, %cst_9 {dimension_numbers = #tpu.dot_dimension_numbers<[1], [0], [0], [1], [0, 0, 1, 1], [], []>} : vector<32x128xbf16>, vector<128x768xbf16>, vector<32x768xf32> -> vector<32x768xf32>
    %c0_10 = arith.constant 0 : index
    %c0_11 = arith.constant 0 : index
    %30 = vector.load %arg6[%c0_10, %c0_11] : memref<1x768xf32, #tpu.memory_space<vmem>>, vector<1x768xf32>
    %31 = vector.broadcast %30 : vector<1x768xf32> to vector<32x768xf32>
    %32 = arith.addf %29, %31 : vector<32x768xf32>
    %cst_12 = arith.constant 0.000000e+00 : f32
    %33 = vector.broadcast %cst_12 : f32 to vector<32x768xf32>
    %34 = arith.maximumf %32, %33 : vector<32x768xf32>
    %35 = arith.truncf %34 : vector<32x768xf32> to vector<32x768xbf16>
    %c0_13 = arith.constant 0 : index
    %c0_14 = arith.constant 0 : index
    %36 = vector.load %arg7[%c0_13, %c0_14] : memref<768x128xbf16, #tpu.memory_space<vmem>>, vector<768x128xbf16>
    %cst_15 = arith.constant dense<0.000000e+00> : vector<32x128xf32>
    %37 = tpu.matmul %35, %36, %cst_15 {dimension_numbers = #tpu.dot_dimension_numbers<[1], [0], [0], [1], [0, 0, 1, 1], [], []>} : vector<32x768xbf16>, vector<768x128xbf16>, vector<32x128xf32> -> vector<32x128xf32>
    %c0_16 = arith.constant 0 : index
    %c0_17 = arith.constant 0 : index
    %38 = vector.load %arg8[%c0_16, %c0_17] : memref<1x128xf32, #tpu.memory_space<vmem>>, vector<1x128xf32>
    %39 = vector.broadcast %38 : vector<1x128xf32> to vector<32x128xf32>
    %40 = arith.addf %37, %39 : vector<32x128xf32>
    %c0_18 = arith.constant 0 : index
    %c0_19 = arith.constant 0 : index
    %41 = vector.load %arg4[%c0_18, %c0_19] : memref<16x128xf32, #tpu.memory_space<vmem>>, vector<16x128xf32>
    %cst_20 = arith.constant dense<0.000000e+00> : vector<32x128xf32>
    %42 = tpu.matmul %17, %41, %cst_20 {dimension_numbers = #tpu.dot_dimension_numbers<[1], [0], [0], [1], [0, 0, 1, 1], [], []>} : vector<32x16xf32>, vector<16x128xf32>, vector<32x128xf32> -> vector<32x128xf32>
    %43 = arith.addf %40, %42 : vector<32x128xf32>
    %c0_21 = arith.constant 0 : index
    %c0_22 = arith.constant 0 : index
    %44 = vector.load %arg9[%c0_21, %c0_22] : memref<32x128xf32, #tpu.memory_space<vmem>>, vector<32x128xf32>
    tpu.vector_store %arg9[%c0_21, %c0_22], %43 {strides = array<i32>} : memref<32x128xf32, #tpu.memory_space<vmem>>, vector<32x128xf32>,
    return
  }
  func.func @transform_0(%arg0: i32) -> (i32, i32) {
    %c0_i32 = arith.constant 0 : i32
    %c0_i32_0 = arith.constant 0 : i32
    %c0_i32_1 = arith.constant 0 : i32
    return %c0_i32, %c0_i32_0 : i32, i32
  }
  func.func @transform_1(%arg0: i32) -> (i32, i32) {
    %c0_i32 = arith.constant 0 : i32
    %c0_i32_0 = arith.constant 0 : i32
    %c0_i32_1 = arith.constant 0 : i32
    return %c0_i32, %c0_i32_0 : i32, i32
  }
  func.func @transform_2(%arg0: i32) -> (i32, i32) {
    %c0_i32 = arith.constant 0 : i32
    %c0_i32_0 = arith.constant 0 : i32
    %c0_i32_1 = arith.constant 0 : i32
    return %c0_i32, %c0_i32_0 : i32, i32
  }
  func.func @transform_3(%arg0: i32) -> (i32, i32) {
    %c0_i32 = arith.constant 0 : i32
    %c0_i32_0 = arith.constant 0 : i32
    %c0_i32_1 = arith.constant 0 : i32
    return %c0_i32, %c0_i32_0 : i32, i32
  }
  func.func @transform_4(%arg0: i32) -> (i32, i32) {
    %c0_i32 = arith.constant 0 : i32
    %c0_i32_0 = arith.constant 0 : i32
    %c0_i32_1 = arith.constant 0 : i32
    return %c0_i32, %c0_i32_0 : i32, i32
  }
  func.func @transform_5(%arg0: i32) -> (i32, i32) {
    %c0_i32 = arith.constant 0 : i32
    %c0_i32_0 = arith.constant 0 : i32
    %c0_i32_1 = arith.constant 0 : i32
    return %c0_i32, %c0_i32_0 : i32, i32
  }
  func.func @transform_6(%arg0: i32) -> (i32, i32) {
    %c0_i32 = arith.constant 0 : i32
    %c0_i32_0 = arith.constant 0 : i32
    %c0_i32_1 = arith.constant 0 : i32
    return %c0_i32, %c0_i32_0 : i32, i32
  }
  func.func @transform_7(%arg0: i32) -> (i32, i32) {
    %c0_i32 = arith.constant 0 : i32
    %c0_i32_0 = arith.constant 0 : i32
    %c0_i32_1 = arith.constant 0 : i32
    return %c0_i32, %c0_i32_0 : i32, i32
  }
  func.func @transform_8(%arg0: i32) -> (i32, i32) {
    %c0_i32 = arith.constant 0 : i32
    %c0_i32_0 = arith.constant 0 : i32
    %c0_i32_1 = arith.constant 0 : i32
    return %c0_i32, %c0_i32_0 : i32, i32
  }
}

</mosaic_0001>

<bundles_post_ra>
// kernel: _device_forward.2
= control target key start
LH: loop header
LB: loop body
LE: loop exit
PB: predicated region body
PF: predicated region fallthrough
CT: control target
= control target key end

     0   :  { %10 = vsyncpa [#allocation3], 0  ;;  %s1159_s0 = inlined_call_operand.vmem [shape: f32[16,32], index: 0, kind: input, shape index: {}]   ;;  %s1160_s1 = inlined_call_operand.hbm [shape: bf16[32,768], index: 1, kind: input, shape index: {}]   ;;  %s1161_s2 = inlined_call_operand.vmem [shape: f32[1,768], index: 2, kind: input, shape index: {}]   ;;  %s1162_s3 = inlined_call_operand.hbm [shape: bf16[768,128], index: 3, kind: input, shape index: {}]   ;;  %s1163_s4 = inlined_call_operand.vmem [shape: f32[1,128], index: 4, kind: input, shape index: {}]   ;;  %s1164_s5 = inlined_call_operand.vmem [shape: f32[16,128], index: 5, kind: output, shape index: {}]  }
   0x1   :  { %s18_s20 = sshll.u32 %s1160_s1, 4  ;;  %s19_s20 = int_to_ptr.hbm [resolvable:$true] %s18_s20 }
   0x2   :  { %11 = vsyncpa [#allocation5], 0  ;;  %s1093_s21 = smov [#allocation2]   ;;  %s33_s25 = sshll.u32 %s1162_s3, 4  ;;  %s34_s25 = int_to_ptr.hbm [resolvable:$true] %s33_s25 }
   0x3   :  { %s20_s22 = sshll.u32 %s1093_s21, 4  ;;  %s1094_s26 = smov 384   ;;  %s21_s22 = int_to_ptr.vmem [resolvable:$true] %s20_s22 }
   0x4   :  { %s1095_s27 = smov 24   ;;  %s1096_s28 = smov [#allocation4]  }
   0x5   :  { %26 = dma.hbm_to_vmem [thread:$0]  %s19_s20, 1536, %s21_s22, [#allocation3], %s1094_s26, %s1094_s26, %s1095_s27  }
   0x6   :  { %s35_s29 = sshll.u32 %s1096_s28, 4  ;;  %s1097_s30 = smov 64   ;;  %s36_s29 = int_to_ptr.vmem [resolvable:$true] %s35_s29 }
   0x7   :  { %s1098_s6 = smov 4  }
   0x8   :  { %41 = dma.hbm_to_vmem [thread:$0]  %s34_s25, 6144, %s36_s29, [#allocation5], %s1097_s30, %s1097_s30, %s1098_s6  }
   0x9   :  { %1089 = dma.done.wait [#allocation3], 1536  }
   0xa   :  { %1090 = vsyncadd [#allocation3], 4294965760 }
   0xb   :  { %1091 = dma.done.wait [#allocation5], 6144  }
   0xc   :  { %1092 = vsyncadd [#allocation5], 4294961152  ;;  %v754_v0 = vld [vmem:[#allocation2 + $0x30] sm:$0xf]  ;;  %v983_v1 = vld [vmem:[#allocation2 + $0x44] sm:$0xf0] }
   0xd   :  { %v980_v2 = vld [vmem:[#allocation2 + $0x34] sm:$0xf]  ;;  %v755_v3 = vor.u32 %v983_v1, %v754_v0  ;;  %v756_v4 = vld [vmem:[#allocation2 + $0x48] sm:$0xf0]  ;;  %v762_v5 = vld [vmem:[#allocation2 + $0x38] sm:$0xf] }
   0xe   :  { %v984_v6 = vld [vmem:[#allocation2 + $0x4c] sm:$0xf0]  ;;  %v759_v7 = vor.u32 %v980_v2, %v756_v4  ;;  %v981_v9 = vld [vmem:[#allocation2 + $0x3c] sm:$0xf]  ;;  %v764_v10 = vld [vmem:[#allocation2 + $0x50] sm:$0xf0] }
   0xf   :  { %v763_v8 = vor.u32 %v984_v6, %v762_v5  ;;  %v730_v11 = vld [vmem:[#allocation2] sm:$0xf]  ;;  %152 = vmatpush.bf16.msra.mxu0 %v755_v3  ;;  %v767_v12 = vor.u32 %v981_v9, %v764_v10  ;;  %v977_v13 = vld [vmem:[#allocation2 + $0x14] sm:$0xf0]  ;;  %v974_v14 = vld [vmem:[#allocation2 + $0x4] sm:$0xf] }
  0x10   :  { %v732_v15 = vld [vmem:[#allocation2 + $0x18] sm:$0xf0]  ;;  %166 = vmatpush.bf16.msra.mxu1 %v759_v7  ;;  %v731_v16 = vor.u32 %v977_v13, %v730_v11  ;;  %v738_v18 = vld [vmem:[#allocation2 + $0x8] sm:$0xf]  ;;  %v978_v19 = vld [vmem:[#allocation2 + $0x1c] sm:$0xf0] }
  0x11   :  { %180 = vmatpush.bf16.msra.mxu2 %v763_v8  ;;  %v735_v17 = vor.u32 %v974_v14, %v732_v15  ;;  %v975_v20 = vld [vmem:[#allocation2 + $0xc] sm:$0xf]  ;;  %194 = vmatpush.bf16.msra.mxu3 %v767_v12  ;;  %v739_v21 = vor.u32 %v978_v19, %v738_v18  ;;  %v740_v22 = vld [vmem:[#allocation2 + $0x20] sm:$0xf0]  ;;  %vm142_vm0 = vcmask 261120   ;;  %v993_v37 = vld [vmem:[#allocation4 + $0x38] sm:$0xff] }
  0x12   :  { %v53_v23 = vld [vmem:[%s1159_s0] sm:$0xff]  ;;  %v54_v24 = vld [vmem:[%s1159_s0 + $0x8] sm:$0xff]  ;;  %v743_v25 = vor.u32 %v975_v20, %v740_v22  ;;  %v985_v28 = vld [vmem:[#allocation2 + $0x54] sm:$0xf0] }
  0x13   :  { %v55_v26 = vpack.c.bf16 %v54_v24, %v53_v23  ;;  %v770_v27 = vld [vmem:[#allocation2 + $0x40] sm:$0xf]  ;;  %v982_v29 = vld [vmem:[#allocation2 + $0x44] sm:$0xf]  ;;  %153 = vmatpush.bf16.msra.mxu0 %v731_v16  ;;  %v772_v31 = vld [vmem:[#allocation2 + $0x58] sm:$0xf0] }
  0x14   :  { %v771_v30 = vor.u32 %v985_v28, %v770_v27  ;;  %v746_v32 = vld [vmem:[#allocation2 + $0x10] sm:$0xf]  ;;  %v979_v33 = vld [vmem:[#allocation2 + $0x24] sm:$0xf0]  ;;  %167 = vmatpush.bf16.msra.mxu1 %v735_v17  ;;  %v775_v34 = vor.u32 %v982_v29, %v772_v31  ;;  %v976_v35 = vld [vmem:[#allocation2 + $0x14] sm:$0xf] }
  0x15   :  { %181 = vmatpush.bf16.msra.mxu2 %v739_v21  ;;  %v748_v36 = vld [vmem:[#allocation2 + $0x28] sm:$0xf0]  ;;  %195 = vmatpush.bf16.msra.mxu3 %v743_v25  ;;  %v747_v38 = vor.u32 %v979_v33, %v746_v32  ;;  %v1001_v39 = vld [vmem:[#allocation4 + $0x78] sm:$0xff]  ;;  %v992_v41 = vld [vmem:[#allocation4 + $0x30] sm:$0xff] }
  0x16   :  { %776 = vmatmul.msk.bf16.vlgmr.msra.gmra.mxu0 %vm142_vm0, %v55_v26  ;;  %v751_v40 = vor.u32 %v976_v35, %v748_v36  ;;  %v1009_v42 = vld [vmem:[#allocation4 + $0xb8] sm:$0xff]  ;;  %v1000_v44 = vld [vmem:[#allocation4 + $0x70] sm:$0xff]  ;;  %v991_v47 = vld [vmem:[#allocation4 + $0x28] sm:$0xff] }
  0x17   :  { %208 = vmatpush.bf16.msrb.mxu0 %v771_v30  ;;  %777 = vmatmul.msk.bf16.vlgmr.msra.gmra.mxu1 %vm142_vm0, %v55_v26  ;;  %v1017_v43 = vld [vmem:[#allocation4 + $0xf8] sm:$0xff]  ;;  %v1008_v45 = vld [vmem:[#allocation4 + $0xb0] sm:$0xff]  ;;  %v999_v48 = vld [vmem:[#allocation4 + $0x68] sm:$0xff] }
  0x18   :  { %222 = vmatpush.bf16.msrb.mxu1 %v775_v34  ;;  %778 = vmatmul.msk.bf16.vlgmr.msra.gmra.mxu2 %vm142_vm0, %v55_v26  ;;  %v1016_v46 = vld [vmem:[#allocation4 + $0xf0] sm:$0xff]  ;;  %v1007_v49 = vld [vmem:[#allocation4 + $0xa8] sm:$0xff]  ;;  %v990_v51 = vld [vmem:[#allocation4 + $0x20] sm:$0xff] }
  0x19   :  { %779 = vmatmul.msk.bf16.vlgmr.msra.gmra.mxu3 %vm142_vm0, %v55_v26  ;;  %636 = vmatpush.bf16.msrb.mxu2 %v993_v37  ;;  %v1015_v50 = vld [vmem:[#allocation4 + $0xe8] sm:$0xff]  ;;  %v998_v52 = vld [vmem:[#allocation4 + $0x60] sm:$0xff]  ;;  %v989_v53 = vld [vmem:[#allocation4 + $0x18] sm:$0xff] }
  0x1a   :  { %650 = vmatpush.bf16.msrb.mxu3 %v1001_v39  ;;  %v997_v54 = vld [vmem:[#allocation4 + $0x58] sm:$0xff]  ;;  %v988_v55 = vld [vmem:[#allocation4 + $0x10] sm:$0xff]  ;;  %v987_v57 = vld [vmem:[#allocation4 + $0x8] sm:$0xff] }
  0x1b   :  { %209 = vmatpush.bf16.msrb.mxu0 %v747_v38  ;;  %v996_v56 = vld [vmem:[#allocation4 + $0x50] sm:$0xff]  ;;  %v995_v58 = vld [vmem:[#allocation4 + $0x48] sm:$0xff]  ;;  %v986_v59 = vld [vmem:[#allocation4] sm:$0xff] }
  0x1c   :  { %223 = vmatpush.bf16.msrb.mxu1 %v751_v40  ;;  %v994_v60 = vld [vmem:[#allocation4 + $0x40] sm:$0xff]  ;;  %v1025_v61 = vld [vmem:[#allocation4 + $0x138] sm:$0xff]  ;;  %v1024_v1 = vld [vmem:[#allocation4 + $0x130] sm:$0xff] }
  0x1d   :  { %637 = vmatpush.bf16.msrb.mxu2 %v992_v41  ;;  %v1033_v62 = vld [vmem:[#allocation4 + $0x178] sm:$0xff]  ;;  %v1006_v63 = vld [vmem:[#allocation4 + $0xa0] sm:$0xff]  ;;  %v1032_v2 = vld [vmem:[#allocation4 + $0x170] sm:$0xff] }
  0x1e   :  { %651 = vmatpush.bf16.msrb.mxu3 %v1000_v44  ;;  %v1014_v0 = vld [vmem:[#allocation4 + $0xe0] sm:$0xff]  ;;  %v1005_v3 = vld [vmem:[#allocation4 + $0x98] sm:$0xff]  ;;  %v1023_v5 = vld [vmem:[#allocation4 + $0x128] sm:$0xff] }
  0x1f   :  { %664 = vmatpush.bf16.msra.mxu0 %v1009_v42  ;;  %v1013_v4 = vld [vmem:[#allocation4 + $0xd8] sm:$0xff]  ;;  %v1031_v6 = vld [vmem:[#allocation4 + $0x168] sm:$0xff]  ;;  %v1004_v7 = vld [vmem:[#allocation4 + $0x90] sm:$0xff] }
  0x20   :  { %678 = vmatpush.bf16.msra.mxu1 %v1017_v43  ;;  %v1012_v8 = vld [vmem:[#allocation4 + $0xd0] sm:$0xff]  ;;  %v1022_v9 = vld [vmem:[#allocation4 + $0x120] sm:$0xff]  ;;  %v1003_v11 = vld [vmem:[#allocation4 + $0x88] sm:$0xff] }
  0x21   :  { %638 = vmatpush.bf16.msrb.mxu2 %v991_v47  ;;  %v1030_v10 = vld [vmem:[#allocation4 + $0x160] sm:$0xff]  ;;  %v1011_v12 = vld [vmem:[#allocation4 + $0xc8] sm:$0xff]  ;;  %v1021_v13 = vld [vmem:[#allocation4 + $0x118] sm:$0xff] }
  0x22   :  { %652 = vmatpush.bf16.msrb.mxu3 %v999_v48  ;;  %v1029_v14 = vld [vmem:[#allocation4 + $0x158] sm:$0xff]  ;;  %v1002_v15 = vld [vmem:[#allocation4 + $0x80] sm:$0xff]  ;;  %v1020_v17 = vld [vmem:[#allocation4 + $0x110] sm:$0xff] }
  0x23   :  { %665 = vmatpush.bf16.msra.mxu0 %v1008_v45  ;;  %v1010_v16 = vld [vmem:[#allocation4 + $0xc0] sm:$0xff]  ;;  %v1028_v18 = vld [vmem:[#allocation4 + $0x150] sm:$0xff]  ;;  %v1019_v19 = vld [vmem:[#allocation4 + $0x108] sm:$0xff] }
  0x24   :  { %679 = vmatpush.bf16.msra.mxu1 %v1016_v46  ;;  %v1027_v20 = vld [vmem:[#allocation4 + $0x148] sm:$0xff]  ;;  %v1018_v21 = vld [vmem:[#allocation4 + $0x100] sm:$0xff] }
  0x25   :  { %639 = vmatpush.bf16.msrb.mxu2 %v990_v51  ;;  %v1026_v22 = vld [vmem:[#allocation4 + $0x140] sm:$0xff] }
  0x26   :  { %653 = vmatpush.bf16.msrb.mxu3 %v998_v52  ;;  %780 = vmatmul.msk.bf16.vlgmr.msrb.gmra.mxu0 %vm142_vm0, %v55_v26  ;;  %v68_v23 = vld [vmem:[%s1161_s2] sm:$0x3f] }
  0x27   :  { %666 = vmatpush.bf16.msra.mxu0 %v1007_v49  ;;  %781 = vmatmul.msk.bf16.vlgmr.msrb.gmra.mxu1 %vm142_vm0, %v55_v26  ;;  %v70_v26 = vperm.slane %v68_v23, 0  ;;  %v71_v27 = vperm.slane %v68_v23, 1  ;;  %v72_v31 = vperm.slane %v68_v23, 2  ;;  %v73_v34 = vperm.slane %v68_v23, 3 }
  0x28   :  { %680 = vmatpush.bf16.msra.mxu1 %v1015_v50 }
  0x29   :  { %640 = vmatpush.bf16.msrb.mxu2 %v989_v53 }
  0x2a   :  { %654 = vmatpush.bf16.msrb.mxu3 %v997_v54 }
  0x2b   :  { %667 = vmatpush.bf16.msra.mxu0 %v1006_v63 }
  0x2c   :  { %681 = vmatpush.bf16.msra.mxu1 %v1014_v0 }
  0x2d   :  { %641 = vmatpush.bf16.msrb.mxu2 %v988_v55 }
  0x2e   :  { %655 = vmatpush.bf16.msrb.mxu3 %v996_v56  ;;  %v74_v56 = vperm.slane %v68_v23, 4 }
  0x2f   :  { %668 = vmatpush.bf16.msra.mxu0 %v1005_v3 }
  0x30   :  { %682 = vmatpush.bf16.msra.mxu1 %v1013_v4 }
  0x31   :  { %642 = vmatpush.bf16.msrb.mxu2 %v987_v57 }
  0x32   :  { %656 = vmatpush.bf16.msrb.mxu3 %v995_v58  ;;  %v75_v58 = vperm.slane %v68_v23, 5 }
  0x33   :  { %669 = vmatpush.bf16.msra.mxu0 %v1004_v7 }
  0x34   :  { %683 = vmatpush.bf16.msra.mxu1 %v1012_v8  ;;  %v1040_v8 = vld [vmem:[%s1163_s4] ss:$0 sm:$0xff] }
  0x35   :  { %643 = vmatpush.bf16.msrb.mxu2 %v986_v59 }
  0x36   :  { %657 = vmatpush.bf16.msrb.mxu3 %v994_v60 }
  0x37   :  { %670 = vmatpush.bf16.msra.mxu0 %v1003_v11 }
  0x38   :  { %684 = vmatpush.bf16.msra.mxu1 %v1011_v12 }
  0x39   :  { %692 = vmatpush.bf16.msra.mxu2 %v1025_v61 }
  0x3a   :  { %706 = vmatpush.bf16.msra.mxu3 %v1033_v62 }
  0x3b   :  { %671 = vmatpush.bf16.msra.mxu0 %v1002_v15 }
  0x3c   :  { %685 = vmatpush.bf16.msra.mxu1 %v1010_v16 }
  0x3d   :  { %693 = vmatpush.bf16.msra.mxu2 %v1024_v1 }
  0x3e   :  { %707 = vmatpush.bf16.msra.mxu3 %v1032_v2 }
  0x41   :  { %694 = vmatpush.bf16.msra.mxu2 %v1023_v5 }
  0x42   :  { %708 = vmatpush.bf16.msra.mxu3 %v1031_v6 }
  0x45   :  { %695 = vmatpush.bf16.msra.mxu2 %v1022_v9 }
  0x46   :  { %709 = vmatpush.bf16.msra.mxu3 %v1030_v10 }
  0x49   :  { %696 = vmatpush.bf16.msra.mxu2 %v1021_v13 }
  0x4a   :  { %710 = vmatpush.bf16.msra.mxu3 %v1029_v14 }
  0x4d   :  { %697 = vmatpush.bf16.msra.mxu2 %v1020_v17 }
  0x4e   :  { %711 = vmatpush.bf16.msra.mxu3 %v1028_v18 }
  0x51   :  { %698 = vmatpush.bf16.msra.mxu2 %v1019_v19 }
  0x52   :  { %712 = vmatpush.bf16.msra.mxu3 %v1027_v20 }
  0x55   :  { %699 = vmatpush.bf16.msra.mxu2 %v1018_v21 }
  0x56   :  { %713 = vmatpush.bf16.msra.mxu3 %v1026_v22 }
  0x93   :  { %v155_v24 = vpop.f32.mrf.mxu0 }
  0x94   :  { %v169_v25 = vpop.f32.mrf.mxu1  ;;  %v156_v28 = vadd.f32 %v155_v24, %v70_v26 }
  0x95   :  { %v170_v30 = vadd.f32 %v169_v25, %v71_v27 }
  0x96   :  { %v230_v38 = vmax.f32 %v156_v28, 0.0 }
  0x97   :  { %v231_v40 = vmax.f32 %v170_v30, 0.0 }
  0x9b   :  { %v183_v29 = vpop.f32.mrf.mxu2  ;;  %v157_v33 = vpop.f32.mrf.mxu0 }
  0x9c   :  { %v197_v32 = vpop.f32.mrf.mxu3  ;;  %v158_v35 = vadd.f32 %v157_v33, %v70_v26  ;;  %v171_v36 = vpop.f32.mrf.mxu1  ;;  %v184_v41 = vadd.f32 %v183_v29, %v72_v31 }
  0x9d   :  { %v172_v37 = vadd.f32 %v171_v36, %v71_v27  ;;  %v198_v43 = vadd.f32 %v197_v32, %v73_v34 }
  0x9e   :  { %v236_v39 = vmax.f32 %v158_v35, 0.0  ;;  %v232_v47 = vmax.f32 %v184_v41, 0.0 }
  0x9f   :  { %v237_v42 = vmax.f32 %v172_v37, 0.0  ;;  %v233_v51 = vmax.f32 %v198_v43, 0.0 }
  0xa0   :  { %v242_v44 = vpack.c.bf16 %v236_v39, %v230_v38 }
  0xa1   :  { %v243_v45 = vpack.c.bf16 %v237_v42, %v231_v40 }
  0xa2   :  { %644 = vmatmul.bf16.vlgmr.msrb.gmra.mxu2 %v242_v44 }
  0xa3   :  { %v185_v46 = vpop.f32.mrf.mxu2  ;;  %658 = vmatmul.bf16.vlgmr.msrb.gmra.mxu3 %v243_v45  ;;  %v211_v50 = vpop.f32.mrf.mxu0 }
  0xa4   :  { %v186_v48 = vadd.f32 %v185_v46, %v72_v31  ;;  %v199_v49 = vpop.f32.mrf.mxu3  ;;  %v225_v53 = vpop.f32.mrf.mxu1  ;;  %v212_v60 = vadd.f32 %v211_v50, %v74_v56 }
  0xa5   :  { %v200_v52 = vadd.f32 %v199_v49, %v73_v34  ;;  %v226_v61 = vadd.f32 %v225_v53, %v75_v58 }
  0xa6   :  { %v238_v54 = vmax.f32 %v186_v48, 0.0  ;;  %v234_v2 = vmax.f32 %v212_v60, 0.0 }
  0xa7   :  { %v239_v55 = vmax.f32 %v200_v52, 0.0  ;;  %v235_v4 = vmax.f32 %v226_v61, 0.0 }
  0xa8   :  { %v244_v57 = vpack.c.bf16 %v238_v54, %v232_v47 }
  0xa9   :  { %v245_v59 = vpack.c.bf16 %v239_v55, %v233_v51 }
  0xaa   :  { %672 = vmatmul.bf16.vlgmr.msra.gmra.mxu0 %v244_v57 }
  0xab   :  { %686 = vmatmul.bf16.vlgmr.msra.gmra.mxu1 %v245_v59  ;;  %v213_v62 = vpop.f32.mrf.mxu0 }
  0xac   :  { %v214_v63 = vadd.f32 %v213_v62, %v74_v56  ;;  %v227_v0 = vpop.f32.mrf.mxu1 }
  0xad   :  { %v228_v1 = vadd.f32 %v227_v0, %v75_v58 }
  0xae   :  { %v240_v3 = vmax.f32 %v214_v63, 0.0 }
  0xaf   :  { %v241_v5 = vmax.f32 %v228_v1, 0.0 }
  0xb0   :  { %v246_v6 = vpack.c.bf16 %v240_v3, %v234_v2 }
  0xb1   :  { %v247_v7 = vpack.c.bf16 %v241_v5, %v235_v4 }
  0xb2   :  { %700 = vmatmul.bf16.vlgmr.msra.gmra.mxu2 %v246_v6 }
  0xb3   :  { %714 = vmatmul.bf16.vlgmr.msra.gmra.mxu3 %v247_v7 }
 0x125   :  { %v645_v9 = vpop.f32.mrf.mxu2 }
 0x126   :  { %v659_v10 = vpop.f32.mrf.mxu3  ;;  %v646_v11 = vadd.f32 %v1040_v8, %v645_v9 }
 0x127   :  { %v673_v13 = vpop.f32.mrf.mxu0 }
 0x128   :  { %v660_v12 = vadd.f32 %v659_v10, %v646_v11  ;;  %v687_v18 = vpop.f32.mrf.mxu1 }
 0x12a   :  { %v674_v16 = vadd.f32 %v673_v13, %v660_v12 }
 0x12c   :  { %v688_v19 = vadd.f32 %v687_v18, %v674_v16 }
 0x12d   :  { %v647_v14 = vpop.f32.mrf.mxu2 }
 0x12e   :  { %v661_v15 = vpop.f32.mrf.mxu3  ;;  %v648_v17 = vadd.f32 %v1040_v8, %v647_v14 }
 0x12f   :  { %v675_v24 = vpop.f32.mrf.mxu0 }
 0x130   :  { %v662_v20 = vadd.f32 %v661_v15, %v648_v17  ;;  %v689_v27 = vpop.f32.mrf.mxu1 }
 0x132   :  { %v676_v25 = vadd.f32 %v675_v24, %v662_v20 }
 0x134   :  { %v690_v28 = vadd.f32 %v689_v27, %v676_v25 }
 0x135   :  { %v701_v21 = vpop.f32.mrf.mxu2 }
 0x136   :  { %v702_v22 = vadd.f32 %v701_v21, %v688_v19  ;;  %v715_v23 = vpop.f32.mrf.mxu3 }
 0x138   :  { %v716_v26 = vadd.f32 %v715_v23, %v702_v22 }
 0x13a   :  { %720 = vst [vmem:[%s1164_s5] sm:$0xff] %v716_v26 }
 0x13d   :  { %v703_v29 = vpop.f32.mrf.mxu2 }
 0x13e   :  { %v704_v30 = vadd.f32 %v703_v29, %v690_v28  ;;  %v717_v31 = vpop.f32.mrf.mxu3 }
 0x140   :  { %v718_v32 = vadd.f32 %v717_v31, %v704_v30 }
 0x142   :  { %721 = vst [vmem:[%s1164_s5 + $0x8] sm:$0xff] %v718_v32 }
 0x143   :  { %726 = vsyncpa [#allocation3], 1 }
 0x144   :  { %727 = vsyncpa [#allocation5], 1 }

// kernel: _device_forward.3
= control target key start
LH: loop header
LB: loop body
LE: loop exit
PB: predicated region body
PF: predicated region fallthrough
CT: control target
= control target key end

     0   :  { %13 = vsyncpa [#allocation3], 0  ;;  %s2049_s0 = inlined_call_operand.vmem [shape: s32[32,1], index: 0, kind: input, shape index: {}]   ;;  %s2050_s1 = inlined_call_operand.vmem [shape: s32[32,1], index: 1, kind: input, shape index: {}]   ;;  %s2051_s2 = inlined_call_operand.vmem [shape: f32[16,32], index: 2, kind: input, shape index: {}]   ;;  %s2052_s3 = inlined_call_operand.vmem [shape: f32[16,128], index: 3, kind: input, shape index: {}]   ;;  %s2053_s4 = inlined_call_operand.hbm [shape: bf16[128,768], index: 4, kind: input, shape index: {}]   ;;  %s2054_s5 = inlined_call_operand.vmem [shape: f32[1,768], index: 5, kind: input, shape index: {}]   ;;  %s2055_s6 = inlined_call_operand.hbm [shape: bf16[768,128], index: 6, kind: input, shape index: {}]   ;;  %s2056_s7 = inlined_call_operand.vmem [shape: f32[1,128], index: 7, kind: input, shape index: {}]   ;;  %s2057_s8 = inlined_call_operand.vmem [shape: f32[32,128], index: 8, kind: output, shape index: {}]  }
   0x1   :  { %s27_s29 = sshll.u32 %s2053_s4, 4  ;;  %s28_s29 = int_to_ptr.hbm [resolvable:$true] %s27_s29 }
   0x2   :  { %14 = vsyncpa [#allocation5], 0  ;;  %s1844_s30 = smov [#allocation2]   ;;  %s42_s12 = sshll.u32 %s2055_s6, 4  ;;  %s43_s12 = int_to_ptr.hbm [resolvable:$true] %s42_s12 }
   0x3   :  { %s29_s9 = sshll.u32 %s1844_s30, 4  ;;  %s1845_s13 = smov 384   ;;  %s30_s9 = int_to_ptr.vmem [resolvable:$true] %s29_s9 }
   0x4   :  { %s1846_s14 = smov 24   ;;  %s1847_s15 = smov [#allocation4]  }
   0x5   :  { %35 = dma.hbm_to_vmem [thread:$0]  %s28_s29, 6144, %s30_s9, [#allocation3], %s1845_s13, %s1845_s13, %s1846_s14  }
   0x6   :  { %s44_s16 = sshll.u32 %s1847_s15, 4  ;;  %s1848_s17 = smov 64   ;;  %s45_s16 = int_to_ptr.vmem [resolvable:$true] %s44_s16 }
   0x7   :  { %s1849_s18 = smov 4  }
   0x8   :  { %50 = dma.hbm_to_vmem [thread:$0]  %s43_s12, 6144, %s45_s16, [#allocation5], %s1848_s17, %s1848_s17, %s1849_s18  }
   0x9   :  { %1840 = dma.done.wait [#allocation3], 6144  }
   0xa   :  { %1841 = vsyncadd [#allocation3], 4294961152 }
   0xb   :  { %1842 = dma.done.wait [#allocation5], 6144  }
   0xc   :  { %1843 = vsyncadd [#allocation5], 4294961152  ;;  %v1850_v0 = vmov 0   ;;  %v84_v1 = vld [vmem:[%s2050_s1] sm:$0xff]  ;;  %v66_v3 = vld [vmem:[%s2049_s0 + $0x10] sm:$0xff]  ;;  %v62_v12 = vlaneseq  ;;  %v1851_v17 = vmov 0.0  }
   0xd   :  { %1789 = vset.pattern.permute.xlu1 %v1850_v0  ;;  %1788 = vset.pattern.permute.xlu0 %v1850_v0  ;;  %v64_v2 = vld [vmem:[%s2049_s0] sm:$0xff]  ;;  %v85_v4 = vld [vmem:[%s2050_s1 + $0x8] sm:$0xff]  ;;  %v67_v6 = vld [vmem:[%s2049_s0 + $0x18] sm:$0xff]  ;;  %vm131_vm4 = vcmask 130048   ;;  %vm236_vm9 = vcmask 261120   ;;  %vm243_vm10 = vcmask 523264  }
   0xe   :  { %1790 = vset.pattern.permute.xlu2 %v1850_v0  ;;  %89 = vperm.xlu1 %1789, %v84_v1   ;;  %v65_v5 = vld [vmem:[%s2049_s0 + $0x8] sm:$0xff]  ;;  %v87_v7 = vld [vmem:[%s2050_s1 + $0x18] sm:$0xff]  ;;  %v86_v8 = vld [vmem:[%s2050_s1 + $0x10] sm:$0xff]  ;;  %v63_v13 = vand.u32 127, %v62_v12  ;;  %s1852_s0 = smov 32   ;;  %vm248_vm11 = vcmask 785408  }
   0xf   :  { %69 = vperm.xlu0 %1788, %v64_v2   ;;  %75 = vperm.xlu2 %1790, %v66_v3   ;;  %v128_v9 = vld [vmem:[%s2051_s2] sm:$0xff]  ;;  %v129_v10 = vld [vmem:[%s2051_s2 + $0x8] sm:$0xff]  ;;  %v1447_v41 = vld [vmem:[#allocation2 + $0x150] sm:$0xf] }
  0x10   :  { %v130_v11 = vpack.c.bf16 %v129_v10, %v128_v9  ;;  %v1722_v42 = vld [vmem:[#allocation2 + $0x164] sm:$0xf0]  ;;  %v1719_v43 = vld [vmem:[#allocation2 + $0x154] sm:$0xf]  ;;  %v1449_v45 = vld [vmem:[#allocation2 + $0x168] sm:$0xf0] }
  0x11   :  { %v1448_v44 = vor.u32 %v1722_v42, %v1447_v41  ;;  %v1455_v46 = vld [vmem:[#allocation2 + $0x158] sm:$0xf]  ;;  %v1723_v47 = vld [vmem:[#allocation2 + $0x16c] sm:$0xf0]  ;;  %v1452_v48 = vor.u32 %v1719_v43, %v1449_v45  ;;  %v1720_v49 = vld [vmem:[#allocation2 + $0x15c] sm:$0xf] }
  0x12   :  { %145 = vmatpush.bf16.msra.mxu0 %v130_v11  ;;  %170 = vmatpush.bf16.msra.mxu1 %v130_v11  ;;  %v1457_v50 = vld [vmem:[#allocation2 + $0x170] sm:$0xf0]  ;;  %v1456_v51 = vor.u32 %v1723_v47, %v1455_v46  ;;  %v1710_v41 = vld [vmem:[#allocation2 + $0x104] sm:$0xf0]  ;;  %v1407_v45 = vld [vmem:[#allocation2 + $0xf8] sm:$0xf] }
  0x13   :  { %556 = vmatpush.bf16.msra.mxu2 %v1448_v44  ;;  %v1460_v52 = vor.u32 %v1720_v49, %v1457_v50  ;;  %575 = vmatpush.bf16.msra.mxu3 %v1452_v48  ;;  %v1707_v42 = vld [vmem:[#allocation2 + $0xf4] sm:$0xf]  ;;  %v1401_v44 = vld [vmem:[#allocation2 + $0x108] sm:$0xf0]  ;;  %v1711_v46 = vld [vmem:[#allocation2 + $0x10c] sm:$0xf0] }
  0x14   :  { %v1404_v47 = vor.u32 %v1707_v42, %v1401_v44  ;;  %v1408_v48 = vor.u32 %v1711_v46, %v1407_v45  ;;  %v1708_v49 = vld [vmem:[#allocation2 + $0xfc] sm:$0xf]  ;;  %v1409_v50 = vld [vmem:[#allocation2 + $0x110] sm:$0xf0]  ;;  %v1279_v44 = vld [vmem:[#allocation2] sm:$0xf] }
  0x15   :  { %v1684_v42 = vld [vmem:[#allocation2 + $0x3c] sm:$0xf]  ;;  %v1680_v46 = vld [vmem:[#allocation2 + $0x14] sm:$0xf0] }
  0x16   :  { %92 = vperm.xlu1 %1789, %v85_v4   ;;  %594 = vmatpush.bf16.msrb.mxu0 %v1456_v51  ;;  %v1375_v51 = vld [vmem:[#allocation2 + $0xc0] sm:$0xf] }
  0x17   :  { %72 = vperm.xlu0 %1788, %v65_v5   ;;  %78 = vperm.xlu2 %1790, %v67_v6  }
  0x18   :  { %613 = vmatpush.bf16.msrb.mxu1 %v1460_v52  ;;  %v1412_v52 = vor.u32 %v1708_v49, %v1409_v50  ;;  %v1280_v49 = vor.u32 %v1680_v46, %v1279_v44  ;;  %v1295_v44 = vld [vmem:[#allocation2 + $0x10] sm:$0xf]  ;;  %v1679_v46 = vld [vmem:[#allocation2 + $0x14] sm:$0xf] }
  0x1e   :  { %98 = vperm.xlu1 %1789, %v87_v7  }
  0x1f   :  { %95 = vperm.xlu0 %1788, %v86_v8  }
  0x69   :  { %v76_v14 = vpop.permute.xlu2 %75 }
  0x6a   :  { %vm82_vm5 = vcmp.eq.s32.totalorder %v63_v13, %v76_v14 }
  0x6b   :  { %v1267_v29 = vsel %vm82_vm5, 1.0, %v1851_v17 }
  0x71   :  { %v79_v25 = vpop.permute.xlu2 %78 }
  0x72   :  { %vm83_vm6 = vcmp.eq.s32.totalorder %v63_v13, %v79_v25  ;;  %v1423_v25 = vld [vmem:[#allocation2 + $0x120] sm:$0xf] }
  0x73   :  { %v1268_v31 = vsel %vm83_vm6, 1.0, %v1851_v17 }
  0x74   :  { %v113_v37 = vpack.c.bf16 %v1268_v31, %v1267_v29 }
  0x80   :  { %v90_v15 = vpop.permute.xlu1 %89 }
  0x81   :  { %v70_v16 = vpop.permute.xlu0 %69  ;;  %vm100_vm0 = vcmp.eq.s32.totalorder %v63_v13, %v90_v15 }
  0x82   :  { %vm80_vm1 = vcmp.eq.s32.totalorder %v63_v13, %v70_v16  ;;  %v1269_v18 = vsel %vm100_vm0, 1.0, %v1851_v17 }
  0x83   :  { %v1265_v19 = vsel %vm80_vm1, 1.0, %v1851_v17 }
  0x84   :  { %v1936_v20 = vadd.f32 %v1269_v18, %v1265_v19 }
  0x88   :  { %v93_v21 = vpop.permute.xlu1 %92 }
  0x89   :  { %v73_v22 = vpop.permute.xlu0 %72  ;;  %vm101_vm2 = vcmp.eq.s32.totalorder %v63_v13, %v93_v21 }
  0x8a   :  { %vm81_vm3 = vcmp.eq.s32.totalorder %v63_v13, %v73_v22  ;;  %v1270_v23 = vsel %vm101_vm2, 1.0, %v1851_v17 }
  0x8b   :  { %v1266_v24 = vsel %vm81_vm3, 1.0, %v1851_v17  ;;  %v122_v26 = vpack.c.bf16 %v1270_v23, %v1269_v18 }
  0x8c   :  { %v112_v27 = vpack.c.bf16 %v1266_v24, %v1265_v19  ;;  %v1938_v28 = vadd.f32 %v1270_v23, %v1266_v24 }
  0x8d   :  { %1275 = vmatmul.msk.bf16.vlgmr.msra.gmra.mxu1 %vm131_vm4, %v122_v26  ;;  %v1716_v26 = vld [vmem:[#allocation2 + $0x134] sm:$0xf0] }
  0x8e   :  { %1273 = vmatmul.msk.bf16.vlgmr.msra.gmra.mxu0 %vm131_vm4, %v112_v27  ;;  %v1713_v27 = vld [vmem:[#allocation2 + $0x124] sm:$0xf] }
  0x90   :  { %v99_v30 = vpop.permute.xlu1 %98 }
  0x91   :  { %v96_v32 = vpop.permute.xlu0 %95  ;;  %vm103_vm7 = vcmp.eq.s32.totalorder %v63_v13, %v99_v30  ;;  %v1425_v30 = vld [vmem:[#allocation2 + $0x138] sm:$0xf0] }
  0x92   :  { %vm102_vm8 = vcmp.eq.s32.totalorder %v63_v13, %v96_v32  ;;  %v1272_v33 = vsel %vm103_vm7, 1.0, %v1851_v17  ;;  %v1717_v32 = vld [vmem:[#allocation2 + $0x13c] sm:$0xf0] }
  0x93   :  { %v1271_v34 = vsel %vm102_vm8, 1.0, %v1851_v17  ;;  %v1942_v35 = vadd.f32 %v1272_v33, %v1268_v31  ;;  %v1431_v31 = vld [vmem:[#allocation2 + $0x128] sm:$0xf] }
  0x94   :  { %v1944_v36 = vadd.f32 %v1271_v34, %v1267_v29  ;;  %v123_v38 = vpack.c.bf16 %v1272_v33, %v1271_v34  ;;  %v1424_v29 = vor.u32 %v1716_v26, %v1423_v25  ;;  %v1428_v33 = vor.u32 %v1713_v27, %v1425_v30  ;;  %v1337_v25 = vld [vmem:[#allocation2 + $0x80] sm:$0xf0] }
  0x95   :  { %v1432_v34 = vor.u32 %v1717_v32, %v1431_v31  ;;  %v1303_v31 = vld [vmem:[#allocation2 + $0x30] sm:$0xf]  ;;  %v1686_v32 = vld [vmem:[#allocation2 + $0x44] sm:$0xf0] }
  0x96   :  { %557 = vmatpush.bf16.msra.mxu2 %v1424_v29  ;;  %576 = vmatpush.bf16.msra.mxu3 %v1428_v33  ;;  %v1683_v33 = vld [vmem:[#allocation2 + $0x34] sm:$0xf] }
  0x97   :  { %595 = vmatpush.bf16.msrb.mxu0 %v1432_v34  ;;  %v1304_v34 = vor.u32 %v1686_v32, %v1303_v31  ;;  %v1694_v31 = vld [vmem:[#allocation2 + $0x84] sm:$0xf0]  ;;  %v1691_v32 = vld [vmem:[#allocation2 + $0x74] sm:$0xf] }
  0x9a   :  { %577 = vmatpush.bf16.msra.mxu3 %v1404_v47  ;;  %v1677_v47 = vld [vmem:[#allocation2 + $0x4] sm:$0xf] }
  0x9b   :  { %596 = vmatpush.bf16.msrb.mxu0 %v1408_v48  ;;  %v1281_v48 = vld [vmem:[#allocation2 + $0x18] sm:$0xf0] }
  0x9c   :  { %v1284_v50 = vor.u32 %v1677_v47, %v1281_v48  ;;  %v1297_v47 = vld [vmem:[#allocation2 + $0x28] sm:$0xf0] }
  0x9d   :  { %1276 = vmatmul.msk.bf16.gmra.mxu1 %vm131_vm4, %v123_v38  ;;  %v1433_v38 = vld [vmem:[#allocation2 + $0x140] sm:$0xf0] }
  0x9e   :  { %1274 = vmatmul.msk.bf16.gmra.mxu0 %vm131_vm4, %v113_v37  ;;  %v1714_v37 = vld [vmem:[#allocation2 + $0x12c] sm:$0xf] }
 0x10a   :  { %v172_v40 = vpop.f32.mrf.mxu1 }
 0x10b   :  { %v147_v39 = vpop.f32.mrf.mxu0  ;;  %v190_v55 = vpack.c.bf16 %v172_v40, %v172_v40 }
 0x10c   :  { %v182_v53 = vmul.f32 %v172_v40, %v147_v39  ;;  %v186_v54 = vpack.c.bf16 %v147_v39, %v147_v39  ;;  %v1436_v39 = vor.u32 %v1714_v37, %v1433_v38  ;;  %v1399_v40 = vld [vmem:[#allocation2 + $0xf0] sm:$0xf]  ;;  %v1305_v37 = vld [vmem:[#allocation2 + $0x48] sm:$0xf0]  ;;  %v1311_v38 = vld [vmem:[#allocation2 + $0x38] sm:$0xf] }
 0x10d   :  { %v212_v63 = vunpack.c.l.b16 %v190_v55  ;;  %v1400_v43 = vor.u32 %v1710_v41, %v1399_v40  ;;  %v1377_v55 = vld [vmem:[#allocation2 + $0xd8] sm:$0xf0]  ;;  %v1308_v40 = vor.u32 %v1683_v33, %v1305_v37 }
 0x10e   :  { %v194_v58 = vpack.c.bf16 %v182_v53, %v182_v53  ;;  %v1948_v62 = vunpack.c.l.b16 %v186_v54  ;;  %614 = vmatpush.bf16.msrb.mxu1 %v1436_v39  ;;  %v1704_v53 = vld [vmem:[#allocation2 + $0xd4] sm:$0xf0]  ;;  %v1701_v54 = vld [vmem:[#allocation2 + $0xc4] sm:$0xf]  ;;  %v1687_v39 = vld [vmem:[#allocation2 + $0x4c] sm:$0xf0] }
 0x10f   :  { %558 = vmatpush.bf16.msra.mxu2 %v1400_v43  ;;  %v1312_v41 = vor.u32 %v1687_v39, %v1311_v38  ;;  %v1313_v43 = vld [vmem:[#allocation2 + $0x50] sm:$0xf0]  ;;  %v1319_v38 = vld [vmem:[#allocation2 + $0x40] sm:$0xf]  ;;  %v1688_v39 = vld [vmem:[#allocation2 + $0x54] sm:$0xf0] }
 0x110   :  { %v226_v3 = vunpack.c.l.b16 %v194_v58  ;;  %v1705_v58 = vld [vmem:[#allocation2 + $0xdc] sm:$0xf0]  ;;  %v1316_v45 = vor.u32 %v1684_v42, %v1313_v43  ;;  %v1320_v42 = vor.u32 %v1688_v39, %v1319_v38  ;;  %v1771_v38 = vld [vmem:[#allocation4 + $0x170] sm:$0xff]  ;;  %v1762_v39 = vld [vmem:[#allocation4 + $0x128] sm:$0xff] }
 0x112   :  { %v174_v57 = vpop.f32.mrf.mxu1  ;;  %615 = vmatpush.bf16.msrb.mxu1 %v1412_v52  ;;  %v1681_v52 = vld [vmem:[#allocation2 + $0x1c] sm:$0xf0] }
 0x113   :  { %v149_v56 = vpop.f32.mrf.mxu0  ;;  %v191_v61 = vpack.c.bf16 %v174_v57, %v174_v57 }
 0x114   :  { %v187_v59 = vpack.c.bf16 %v149_v56, %v149_v56  ;;  %v183_v60 = vmul.f32 %v174_v57, %v149_v56  ;;  %v1376_v56 = vor.u32 %v1704_v53, %v1375_v51  ;;  %v1383_v57 = vld [vmem:[#allocation2 + $0xc8] sm:$0xf]  ;;  %v1678_v53 = vld [vmem:[#allocation2 + $0xc] sm:$0xf] }
 0x115   :  { %v213_v2 = vunpack.c.l.b16 %v191_v61  ;;  %v1384_v61 = vor.u32 %v1705_v58, %v1383_v57  ;;  %v1287_v51 = vld [vmem:[#allocation2 + $0x8] sm:$0xf]  ;;  %v1463_v57 = vld [vmem:[#allocation2 + $0x160] sm:$0xf]  ;;  %v1724_v58 = vld [vmem:[#allocation2 + $0x174] sm:$0xf0] }
 0x116   :  { %v1950_v0 = vunpack.c.l.b16 %v187_v59  ;;  %v195_v1 = vpack.c.bf16 %v183_v60, %v183_v60  ;;  %v1702_v59 = vld [vmem:[#allocation2 + $0xcc] sm:$0xf]  ;;  %v1380_v60 = vor.u32 %v1701_v54, %v1377_v55  ;;  %559 = vmatpush.bf16.msra.mxu2 %v1376_v56  ;;  %v1288_v54 = vor.u32 %v1681_v52, %v1287_v51  ;;  %v1289_v55 = vld [vmem:[#allocation2 + $0x20] sm:$0xf0] }
 0x117   :  { %v216_v6 = vpack.c.b16 %v213_v2, %v212_v63  ;;  %v1385_v63 = vld [vmem:[#allocation2 + $0xe0] sm:$0xf0]  ;;  %v1698_v2 = vld [vmem:[#allocation2 + $0xa4] sm:$0xf0]  ;;  %597 = vmatpush.bf16.msrb.mxu0 %v1384_v61  ;;  %v1292_v56 = vor.u32 %v1678_v53, %v1289_v55  ;;  %v1465_v61 = vld [vmem:[#allocation2 + $0x178] sm:$0xf0] }
 0x118   :  { %v206_v4 = vpack.c.b16 %v1950_v0, %v1948_v62  ;;  %v227_v5 = vunpack.c.l.b16 %v195_v1  ;;  %v1351_v1 = vld [vmem:[#allocation2 + $0x90] sm:$0xf]  ;;  %578 = vmatpush.bf16.msra.mxu3 %v1380_v60  ;;  %v1721_v60 = vld [vmem:[#allocation2 + $0x164] sm:$0xf] }
 0x119   :  { %218 = vrot.lane.b32.xlu2 %v216_v6, %s1852_s0  ;;  %v1353_v6 = vld [vmem:[#allocation2 + $0xa8] sm:$0xf0] }
 0x11a   :  { %v230_v7 = vpack.c.b16 %v227_v5, %v226_v3  ;;  %v177_v9 = vpop.f32.mrf.mxu1  ;;  %v1388_v3 = vor.u32 %v1702_v59, %v1385_v63  ;;  %v1695_v5 = vld [vmem:[#allocation2 + $0x94] sm:$0xf]  ;;  %v1464_v59 = vor.u32 %v1724_v58, %v1463_v57  ;;  %v1468_v63 = vor.u32 %v1721_v60, %v1465_v61  ;;  %v1748_v60 = vld [vmem:[#allocation4 + $0xb8] sm:$0xff] }
 0x11b   :  { %v1954_v8 = vpop.f32.mrf.mxu0  ;;  %v192_v11 = vpack.c.bf16 %v177_v9, %v177_v9  ;;  %v1756_v61 = vld [vmem:[#allocation4 + $0xf8] sm:$0xff] }
 0x11c   :  { %232 = vrot.lane.b32.xlu0 %v230_v7, %s1848_s17  ;;  %v184_v10 = vmul.f32 %v177_v9, %v1954_v8  ;;  %v1359_v7 = vld [vmem:[#allocation2 + $0x98] sm:$0xf]  ;;  %v1699_v9 = vld [vmem:[#allocation2 + $0xac] sm:$0xf0]  ;;  %616 = vmatpush.bf16.msrb.mxu1 %v1388_v3  ;;  %v1715_v3 = vld [vmem:[#allocation2 + $0x134] sm:$0xf] }
 0x11d   :  { %v214_v17 = vunpack.c.l.b16 %v192_v11  ;;  %v1361_v11 = vld [vmem:[#allocation2 + $0xb0] sm:$0xf0] }
 0x11e   :  { %v196_v14 = vpack.c.bf16 %v184_v10, %v184_v10  ;;  %v1696_v10 = vld [vmem:[#allocation2 + $0x9c] sm:$0xf] }
 0x120   :  { %v228_v21 = vunpack.c.l.b16 %v196_v14  ;;  %v1356_v14 = vor.u32 %v1695_v5, %v1353_v6  ;;  %v1441_v6 = vld [vmem:[#allocation2 + $0x148] sm:$0xf0] }
 0x122   :  { %v179_v13 = vpop.f32.mrf.mxu1  ;;  %579 = vmatpush.bf16.msra.mxu3 %v1356_v14 }
 0x123   :  { %v1958_v12 = vpop.f32.mrf.mxu0  ;;  %v193_v16 = vpack.c.bf16 %v179_v13, %v179_v13 }
 0x124   :  { %v185_v15 = vmul.f32 %v179_v13, %v1958_v12  ;;  %v1352_v13 = vor.u32 %v1698_v2, %v1351_v1  ;;  %v1439_v1 = vld [vmem:[#allocation2 + $0x130] sm:$0xf]  ;;  %v1718_v2 = vld [vmem:[#allocation2 + $0x144] sm:$0xf0]  ;;  %v189_v62 = vpack.c.bf16 %v1958_v12, %v1958_v12  ;;  %v1740_v12 = vld [vmem:[#allocation4 + $0x78] sm:$0xff] }
 0x125   :  { %v215_v19 = vunpack.c.l.b16 %v193_v16  ;;  %v1327_v16 = vld [vmem:[#allocation2 + $0x60] sm:$0xf]  ;;  %v1440_v5 = vor.u32 %v1718_v2, %v1439_v1  ;;  %v1755_v1 = vld [vmem:[#allocation4 + $0xf0] sm:$0xff] }
 0x126   :  { %v197_v18 = vpack.c.bf16 %v185_v15, %v185_v15  ;;  %v1360_v15 = vor.u32 %v1699_v9, %v1359_v7  ;;  %560 = vmatpush.bf16.msra.mxu2 %v1352_v13  ;;  %v1444_v7 = vor.u32 %v1715_v3, %v1441_v6  ;;  %v1415_v9 = vld [vmem:[#allocation2 + $0x100] sm:$0xf]  ;;  %v1417_v13 = vld [vmem:[#allocation2 + $0x118] sm:$0xf0]  ;;  %v1731_v2 = vld [vmem:[#allocation4 + $0x30] sm:$0xff] }
 0x127   :  { %v217_v23 = vpack.c.b16 %v215_v19, %v214_v17  ;;  %v1692_v17 = vld [vmem:[#allocation2 + $0x74] sm:$0xf0]  ;;  %v1364_v19 = vor.u32 %v1696_v10, %v1361_v11  ;;  %v1709_v11 = vld [vmem:[#allocation2 + $0x104] sm:$0xf]  ;;  %v1739_v3 = vld [vmem:[#allocation4 + $0x70] sm:$0xff] }
 0x128   :  { %v229_v22 = vunpack.c.l.b16 %v197_v18  ;;  %v1689_v18 = vld [vmem:[#allocation2 + $0x64] sm:$0xf]  ;;  %v1328_v26 = vor.u32 %v1692_v17, %v1327_v16  ;;  %598 = vmatpush.bf16.msrb.mxu0 %v1360_v15  ;;  %v1712_v10 = vld [vmem:[#allocation2 + $0x114] sm:$0xf0]  ;;  %v1420_v15 = vor.u32 %v1709_v11, %v1417_v13  ;;  %v1391_v16 = vld [vmem:[#allocation2 + $0xd0] sm:$0xf] }
 0x129   :  { %220 = vrot.lane.b32.xlu1 %v217_v23, %s1852_s0  ;;  %v1693_v23 = vld [vmem:[#allocation2 + $0x7c] sm:$0xf0]  ;;  %617 = vmatpush.bf16.msrb.mxu1 %v1364_v19  ;;  %v1416_v14 = vor.u32 %v1712_v10, %v1415_v9  ;;  %v1706_v17 = vld [vmem:[#allocation2 + $0xe4] sm:$0xf0]  ;;  %v1393_v19 = vld [vmem:[#allocation2 + $0xe8] sm:$0xf0] }
 0x12a   :  { %v231_v24 = vpack.c.b16 %v229_v22, %v228_v21  ;;  %v1329_v21 = vld [vmem:[#allocation2 + $0x78] sm:$0xf0]  ;;  %v1335_v22 = vld [vmem:[#allocation2 + $0x68] sm:$0xf]  ;;  %561 = vmatpush.bf16.msra.mxu2 %v1328_v26  ;;  %v1745_v10 = vld [vmem:[#allocation4 + $0xa0] sm:$0xff] }
 0x12b   :  { %v1332_v27 = vor.u32 %v1689_v18, %v1329_v21  ;;  %v1336_v29 = vor.u32 %v1693_v23, %v1335_v22  ;;  %v1703_v18 = vld [vmem:[#allocation2 + $0xd4] sm:$0xf]  ;;  %v1392_v21 = vor.u32 %v1706_v17, %v1391_v16  ;;  %v1367_v23 = vld [vmem:[#allocation2 + $0xa0] sm:$0xf]  ;;  %v1754_v6 = vld [vmem:[#allocation4 + $0xe8] sm:$0xff] }
 0x12c   :  { %234 = vrot.lane.b32.xlu2 %v231_v24, %s1848_s17  ;;  %v1690_v24 = vld [vmem:[#allocation2 + $0x6c] sm:$0xf]  ;;  %v1396_v22 = vor.u32 %v1703_v18, %v1393_v19  ;;  %v1753_v11 = vld [vmem:[#allocation4 + $0xe0] sm:$0xff]  ;;  %v1744_v13 = vld [vmem:[#allocation4 + $0x98] sm:$0xff] }
 0x12d   :  { %v1340_v30 = vor.u32 %v1690_v24, %v1337_v25  ;;  %580 = vmatpush.bf16.msra.mxu3 %v1332_v27  ;;  %599 = vmatpush.bf16.msrb.mxu0 %v1336_v29  ;;  %v1700_v24 = vld [vmem:[#allocation2 + $0xb4] sm:$0xf0]  ;;  %v1697_v25 = vld [vmem:[#allocation2 + $0xa4] sm:$0xf]  ;;  %v1369_v27 = vld [vmem:[#allocation2 + $0xb8] sm:$0xf0] }
 0x12e   :  { %562 = vmatpush.bf16.msra.mxu2 %v1304_v34  ;;  %v1368_v26 = vor.u32 %v1700_v24, %v1367_v23  ;;  %v1372_v29 = vor.u32 %v1697_v25, %v1369_v27  ;;  %v1345_v34 = vld [vmem:[#allocation2 + $0x88] sm:$0xf0]  ;;  %v1737_v16 = vld [vmem:[#allocation4 + $0x60] sm:$0xff]  ;;  %v1743_v17 = vld [vmem:[#allocation4 + $0x90] sm:$0xff] }
 0x12f   :  { %618 = vmatpush.bf16.msrb.mxu1 %v1340_v30  ;;  %v1343_v30 = vld [vmem:[#allocation2 + $0x70] sm:$0xf]  ;;  %v1348_v37 = vor.u32 %v1691_v32, %v1345_v34  ;;  %v1738_v9 = vld [vmem:[#allocation4 + $0x68] sm:$0xff]  ;;  %v1728_v19 = vld [vmem:[#allocation4 + $0x18] sm:$0xff] }
 0x130   :  { %v1344_v33 = vor.u32 %v1694_v31, %v1343_v30  ;;  %v1751_v18 = vld [vmem:[#allocation4 + $0xd0] sm:$0xff]  ;;  %v1750_v23 = vld [vmem:[#allocation4 + $0xc8] sm:$0xff]  ;;  %v1749_v27 = vld [vmem:[#allocation4 + $0xc0] sm:$0xff] }
 0x131   :  { %581 = vmatpush.bf16.msra.mxu3 %v1308_v40  ;;  %600 = vmatpush.bf16.msrb.mxu0 %v1312_v41  ;;  %v1685_v40 = vld [vmem:[#allocation2 + $0x44] sm:$0xf]  ;;  %v1321_v41 = vld [vmem:[#allocation2 + $0x58] sm:$0xf0]  ;;  %v1727_v24 = vld [vmem:[#allocation4 + $0x10] sm:$0xff] }
 0x132   :  { %563 = vmatpush.bf16.msra.mxu2 %v1280_v49  ;;  %v1324_v43 = vor.u32 %v1685_v40, %v1321_v41  ;;  %v1735_v25 = vld [vmem:[#allocation4 + $0x50] sm:$0xff]  ;;  %v1734_v30 = vld [vmem:[#allocation4 + $0x48] sm:$0xff]  ;;  %v1725_v31 = vld [vmem:[#allocation4] sm:$0xff] }
 0x133   :  { %619 = vmatpush.bf16.msrb.mxu1 %v1316_v45  ;;  %v1682_v45 = vld [vmem:[#allocation2 + $0x24] sm:$0xf0]  ;;  %v1733_v32 = vld [vmem:[#allocation4 + $0x40] sm:$0xff]  ;;  %v1772_v34 = vld [vmem:[#allocation4 + $0x178] sm:$0xff] }
 0x134   :  { %v1296_v48 = vor.u32 %v1682_v45, %v1295_v44  ;;  %v1770_v40 = vld [vmem:[#allocation4 + $0x168] sm:$0xff]  ;;  %v1988_v41 = vld [vmem:[%s2054_s5] sm:$0x3f] }
 0x135   :  { %582 = vmatpush.bf16.msra.mxu3 %v1284_v50  ;;  %601 = vmatpush.bf16.msrb.mxu0 %v1288_v54  ;;  %v1300_v50 = vor.u32 %v1679_v46, %v1297_v47  ;;  %v188_v54 = vpack.c.bf16 %v1954_v8, %v1954_v8  ;;  %v1732_v8 = vld [vmem:[#allocation4 + $0x38] sm:$0xff]  ;;  %v1761_v44 = vld [vmem:[#allocation4 + $0x120] sm:$0xff]  ;;  %v1991_v46 = vperm.slane %v1988_v41, 2  ;;  %v1994_v47 = vperm.slane %v1988_v41, 3 }
 0x136   :  { %632 = vmatpush.bf16.msrb.mxu2 %v1464_v59  ;;  %v1769_v45 = vld [vmem:[#allocation4 + $0x160] sm:$0xff] }
 0x137   :  { %620 = vmatpush.bf16.msrb.mxu1 %v1292_v56  ;;  %v204_v0 = vunpack.c.l.b16 %v188_v54  ;;  %v1999_v54 = vperm.slane %v1988_v41, 0 }
 0x139   :  { %651 = vmatpush.bf16.msrb.mxu3 %v1468_v63  ;;  %v1747_v63 = vld [vmem:[#allocation4 + $0xb0] sm:$0xff]  ;;  %1094 = vmatpush.bf16.msra.mxu0 %v1732_v8 }
 0x13a   :  { %633 = vmatpush.bf16.msrb.mxu2 %v1440_v5  ;;  %v1746_v5 = vld [vmem:[#allocation4 + $0xa8] sm:$0xff] }
 0x13b   :  { %1113 = vmatpush.bf16.msra.mxu1 %v1740_v12 }
 0x13d   :  { %652 = vmatpush.bf16.msrb.mxu3 %v1444_v7  ;;  %1095 = vmatpush.bf16.msra.mxu0 %v1731_v2  ;;  %v1730_v7 = vld [vmem:[#allocation4 + $0x28] sm:$0xff] }
 0x13e   :  { %634 = vmatpush.bf16.msrb.mxu2 %v1416_v14  ;;  %v1752_v14 = vld [vmem:[#allocation4 + $0xd8] sm:$0xff] }
 0x13f   :  { %1114 = vmatpush.bf16.msra.mxu1 %v1739_v3 }
 0x141   :  { %653 = vmatpush.bf16.msrb.mxu3 %v1420_v15  ;;  %1096 = vmatpush.bf16.msra.mxu0 %v1730_v7  ;;  %v1729_v15 = vld [vmem:[#allocation4 + $0x20] sm:$0xff] }
 0x142   :  { %635 = vmatpush.bf16.msrb.mxu2 %v1392_v21  ;;  %v1736_v21 = vld [vmem:[#allocation4 + $0x58] sm:$0xff] }
 0x143   :  { %1115 = vmatpush.bf16.msra.mxu1 %v1738_v9 }
 0x145   :  { %654 = vmatpush.bf16.msrb.mxu3 %v1396_v22  ;;  %1097 = vmatpush.bf16.msra.mxu0 %v1729_v15  ;;  %v1742_v22 = vld [vmem:[#allocation4 + $0x88] sm:$0xff] }
 0x146   :  { %636 = vmatpush.bf16.msrb.mxu2 %v1368_v26  ;;  %v1741_v26 = vld [vmem:[#allocation4 + $0x80] sm:$0xff] }
 0x147   :  { %1116 = vmatpush.bf16.msra.mxu1 %v1737_v16 }
 0x149   :  { %655 = vmatpush.bf16.msrb.mxu3 %v1372_v29  ;;  %1098 = vmatpush.bf16.msra.mxu0 %v1728_v19  ;;  %v1726_v29 = vld [vmem:[#allocation4 + $0x8] sm:$0xff] }
 0x14a   :  { %637 = vmatpush.bf16.msrb.mxu2 %v1344_v33  ;;  %v1764_v33 = vld [vmem:[#allocation4 + $0x138] sm:$0xff] }
 0x14b   :  { %1117 = vmatpush.bf16.msra.mxu1 %v1736_v21  ;;  %v1757_v21 = vld [vmem:[#allocation4 + $0x100] sm:$0xff] }
 0x14d   :  { %656 = vmatpush.bf16.msrb.mxu3 %v1348_v37  ;;  %1099 = vmatpush.bf16.msra.mxu0 %v1727_v24  ;;  %v1763_v37 = vld [vmem:[#allocation4 + $0x130] sm:$0xff] }
 0x14e   :  { %638 = vmatpush.bf16.msrb.mxu2 %v1320_v42 }
 0x14f   :  { %1118 = vmatpush.bf16.msra.mxu1 %v1735_v25 }
 0x151   :  { %657 = vmatpush.bf16.msrb.mxu3 %v1324_v43  ;;  %1100 = vmatpush.bf16.msra.mxu0 %v1726_v29 }
 0x152   :  { %639 = vmatpush.bf16.msrb.mxu2 %v1296_v48  ;;  %v1760_v48 = vld [vmem:[#allocation4 + $0x118] sm:$0xff] }
 0x153   :  { %1119 = vmatpush.bf16.msra.mxu1 %v1734_v30 }
 0x155   :  { %658 = vmatpush.bf16.msrb.mxu3 %v1300_v50  ;;  %1101 = vmatpush.bf16.msra.mxu0 %v1725_v31 }
 0x157   :  { %1120 = vmatpush.bf16.msra.mxu1 %v1733_v32 }
 0x173   :  { %v219_v49 = vpop.permute.xlu2 %218 }
 0x174   :  { %v239_v51 = vsel %vm236_vm9, %v206_v4, %v219_v49  ;;  %v205_v4 = vunpack.c.l.b16 %v189_v62  ;;  %v1768_v49 = vld [vmem:[#allocation4 + $0x158] sm:$0xff]  ;;  %v2002_v62 = vperm.slane %v1988_v41, 1 }
 0x176   :  { %v207_v55 = vpack.c.b16 %v205_v4, %v204_v0 }
 0x186   :  { %v235_v57 = vpop.permute.xlu2 %234 }
 0x18e   :  { %v233_v52 = vpop.permute.xlu0 %232 }
 0x18f   :  { %v245_v53 = vsel %vm243_vm10, %v239_v51, %v233_v52 }
 0x190   :  { %1469 = vmatmul.msk.bf16.vlgmr.msra.gmra.mxu2 %vm248_vm11, %v245_v53  ;;  %1471 = vmatmul.msk.bf16.vlgmr.msra.gmra.mxu3 %vm248_vm11, %v245_v53 }
 0x191   :  { %1473 = vmatmul.msk.bf16.vlgmr.msrb.gmra.mxu0 %vm248_vm11, %v245_v53  ;;  %1475 = vmatmul.msk.bf16.vlgmr.msrb.gmra.mxu1 %vm248_vm11, %v245_v53 }
 0x192   :  { %1132 = vmatpush.bf16.msra.mxu2 %v1748_v60  ;;  %1151 = vmatpush.bf16.msra.mxu3 %v1756_v61  ;;  %v1758_v60 = vld [vmem:[#allocation4 + $0x108] sm:$0xff] }
 0x193   :  { %1170 = vmatpush.bf16.msrb.mxu0 %v1764_v33  ;;  %1189 = vmatpush.bf16.msrb.mxu1 %v1772_v34  ;;  %v1766_v61 = vld [vmem:[#allocation4 + $0x148] sm:$0xff] }
 0x196   :  { %1133 = vmatpush.bf16.msra.mxu2 %v1747_v63  ;;  %1152 = vmatpush.bf16.msra.mxu3 %v1755_v1 }
 0x197   :  { %1171 = vmatpush.bf16.msrb.mxu0 %v1763_v37  ;;  %1190 = vmatpush.bf16.msrb.mxu1 %v1771_v38 }
 0x19a   :  { %1134 = vmatpush.bf16.msra.mxu2 %v1746_v5  ;;  %1153 = vmatpush.bf16.msra.mxu3 %v1754_v6 }
 0x19b   :  { %v221_v56 = vpop.permute.xlu1 %220  ;;  %1172 = vmatpush.bf16.msrb.mxu0 %v1762_v39  ;;  %1191 = vmatpush.bf16.msrb.mxu1 %v1770_v40 }
 0x19c   :  { %v242_v58 = vsel %vm236_vm9, %v207_v55, %v221_v56  ;;  %v1759_v55 = vld [vmem:[#allocation4 + $0x110] sm:$0xff] }
 0x19d   :  { %v247_v59 = vsel %vm243_vm10, %v242_v58, %v235_v57  ;;  %v1767_v56 = vld [vmem:[#allocation4 + $0x150] sm:$0xff]  ;;  %v1209_v57 = vld [vmem:[%s2052_s3 + $0x8] sm:$0xff] }
 0x19e   :  { %1135 = vmatpush.bf16.msra.mxu2 %v1745_v10  ;;  %1154 = vmatpush.bf16.msra.mxu3 %v1753_v11  ;;  %v1208_v10 = vld [vmem:[%s2052_s3] sm:$0xff] }
 0x19f   :  { %1173 = vmatpush.bf16.msrb.mxu0 %v1761_v44  ;;  %1192 = vmatpush.bf16.msrb.mxu1 %v1769_v45 }
 0x1a0   :  { %1470 = vmatmul.msk.bf16.gmra.mxu2 %vm248_vm11, %v247_v59  ;;  %1472 = vmatmul.msk.bf16.gmra.mxu3 %vm248_vm11, %v247_v59 }
 0x1a1   :  { %1474 = vmatmul.msk.bf16.gmra.mxu0 %vm248_vm11, %v247_v59  ;;  %1476 = vmatmul.msk.bf16.gmra.mxu1 %vm248_vm11, %v247_v59 }
 0x1a2   :  { %1136 = vmatpush.bf16.msra.mxu2 %v1744_v13  ;;  %1155 = vmatpush.bf16.msra.mxu3 %v1752_v14 }
 0x1a3   :  { %1174 = vmatpush.bf16.msrb.mxu0 %v1760_v48  ;;  %1193 = vmatpush.bf16.msrb.mxu1 %v1768_v49 }
 0x1a6   :  { %1137 = vmatpush.bf16.msra.mxu2 %v1743_v17  ;;  %1156 = vmatpush.bf16.msra.mxu3 %v1751_v18 }
 0x1a7   :  { %1175 = vmatpush.bf16.msrb.mxu0 %v1759_v55  ;;  %1194 = vmatpush.bf16.msrb.mxu1 %v1767_v56  ;;  %v308_v56 = vperm.slane %v1988_v41, 4 }
 0x1aa   :  { %1138 = vmatpush.bf16.msra.mxu2 %v1742_v22  ;;  %1157 = vmatpush.bf16.msra.mxu3 %v1750_v23  ;;  %v1765_v22 = vld [vmem:[#allocation4 + $0x140] sm:$0xff] }
 0x1ab   :  { %1176 = vmatpush.bf16.msrb.mxu0 %v1758_v60  ;;  %1195 = vmatpush.bf16.msrb.mxu1 %v1766_v61 }
 0x1ae   :  { %1139 = vmatpush.bf16.msra.mxu2 %v1741_v26  ;;  %1158 = vmatpush.bf16.msra.mxu3 %v1749_v27 }
 0x1af   :  { %1177 = vmatpush.bf16.msrb.mxu0 %v1757_v21  ;;  %1196 = vmatpush.bf16.msrb.mxu1 %v1765_v22 }
 0x1b0   :  { %1477 = vmatmul.msk.bf16.vlgmr.msrb.gmra.mxu2 %vm248_vm11, %v245_v53  ;;  %1479 = vmatmul.msk.bf16.vlgmr.msrb.gmra.mxu3 %vm248_vm11, %v245_v53 }
 0x1b2   :  { %1774 = vmatpush.msrb.mxu2 %v1209_v57  ;;  %1775 = vmatpush.msrb.mxu3 %v1209_v57 }
 0x1b4   :  { %1777 = vmatpush.msrb.mxu2 %v1208_v10  ;;  %1778 = vmatpush.msrb.mxu3 %v1208_v10 }
 0x1c0   :  { %1478 = vmatmul.msk.bf16.gmra.mxu2 %vm248_vm11, %v247_v59  ;;  %1480 = vmatmul.msk.bf16.gmra.mxu3 %vm248_vm11, %v247_v59 }
 0x20e   :  { %v603_v42 = vpop.f32.mrf.mxu0  ;;  %v622_v43 = vpop.f32.mrf.mxu1 }
 0x20f   :  { %v604_v52 = vadd.f32 %v603_v42, %v1991_v46  ;;  %v623_v53 = vadd.f32 %v622_v43, %v1994_v47 }
 0x211   :  { %v672_v8 = vmax.f32 %v604_v52, 0.0  ;;  %v673_v12 = vmax.f32 %v623_v53, 0.0 }
 0x213   :  { %v565_v50 = vpop.f32.mrf.mxu2  ;;  %v584_v51 = vpop.f32.mrf.mxu3 }
 0x214   :  { %v566_v2 = vadd.f32 %v565_v50, %v1999_v54  ;;  %v585_v3 = vadd.f32 %v584_v51, %v2002_v62 }
 0x216   :  { %v605_v0 = vpop.f32.mrf.mxu0  ;;  %v624_v4 = vpop.f32.mrf.mxu1  ;;  %v670_v14 = vmax.f32 %v566_v2, 0.0  ;;  %v671_v15 = vmax.f32 %v585_v3, 0.0 }
 0x217   :  { %v606_v58 = vadd.f32 %v605_v0, %v1991_v46  ;;  %v625_v59 = vadd.f32 %v624_v4, %v1994_v47 }
 0x219   :  { %v678_v63 = vmax.f32 %v606_v58, 0.0  ;;  %v679_v1 = vmax.f32 %v625_v59, 0.0 }
 0x21b   :  { %v696_v5 = vpack.c.bf16 %v678_v63, %v672_v8  ;;  %v697_v6 = vpack.c.bf16 %v679_v1, %v673_v12  ;;  %v567_v7 = vpop.f32.mrf.mxu2  ;;  %v586_v9 = vpop.f32.mrf.mxu3 }
 0x21c   :  { %v568_v11 = vadd.f32 %v567_v7, %v1999_v54  ;;  %v587_v13 = vadd.f32 %v586_v9, %v2002_v62 }
 0x21d   :  { %1140 = vmatmul.bf16.vlgmr.msra.gmra.mxu2 %v696_v5  ;;  %1159 = vmatmul.bf16.vlgmr.msra.gmra.mxu3 %v697_v6 }
 0x21e   :  { %v676_v16 = vmax.f32 %v568_v11, 0.0  ;;  %v677_v17 = vmax.f32 %v587_v13, 0.0  ;;  %v608_v18 = vpop.f32.mrf.mxu0  ;;  %v627_v19 = vpop.f32.mrf.mxu1 }
 0x21f   :  { %v609_v27 = vadd.f32 %v608_v18, %v1991_v46  ;;  %v628_v29 = vadd.f32 %v627_v19, %v1994_v47 }
 0x220   :  { %v694_v23 = vpack.c.bf16 %v676_v16, %v670_v14  ;;  %v695_v24 = vpack.c.bf16 %v677_v17, %v671_v15 }
 0x221   :  { %v684_v34 = vmax.f32 %v609_v27, 0.0  ;;  %v685_v37 = vmax.f32 %v628_v29, 0.0 }
 0x222   :  { %1102 = vmatmul.bf16.vlgmr.msra.gmra.mxu0 %v694_v23  ;;  %1121 = vmatmul.bf16.vlgmr.msra.gmra.mxu1 %v695_v24 }
 0x223   :  { %v570_v25 = vpop.f32.mrf.mxu2  ;;  %v589_v26 = vpop.f32.mrf.mxu3  ;;  %1236 = vmatpush.msra.mxu0 %v1209_v57  ;;  %1773 = vmatpush.msra.mxu1 %v1209_v57  ;;  %v309_v57 = vperm.slane %v1988_v41, 5 }
 0x224   :  { %v571_v40 = vadd.f32 %v570_v25, %v1999_v54  ;;  %v590_v42 = vadd.f32 %v589_v26, %v2002_v62 }
 0x225   :  { %1237 = vmatpush.msra.mxu0 %v1208_v10  ;;  %1776 = vmatpush.msra.mxu1 %v1208_v10 }
 0x226   :  { %v610_v30 = vpop.f32.mrf.mxu0  ;;  %v629_v31 = vpop.f32.mrf.mxu1 }
 0x227   :  { %v611_v32 = vadd.f32 %v610_v30, %v1991_v46  ;;  %v630_v33 = vadd.f32 %v629_v31, %v1994_v47  ;;  %v682_v46 = vmax.f32 %v571_v40, 0.0  ;;  %v683_v47 = vmax.f32 %v590_v42, 0.0 }
 0x229   :  { %v690_v38 = vmax.f32 %v611_v32, 0.0  ;;  %v691_v39 = vmax.f32 %v630_v33, 0.0 }
 0x22b   :  { %v572_v43 = vpop.f32.mrf.mxu2  ;;  %v591_v44 = vpop.f32.mrf.mxu3  ;;  %v702_v45 = vpack.c.bf16 %v690_v38, %v684_v34  ;;  %v703_v48 = vpack.c.bf16 %v691_v39, %v685_v37 }
 0x22c   :  { %v573_v49 = vadd.f32 %v572_v43, %v1999_v54  ;;  %v592_v50 = vadd.f32 %v591_v44, %v2002_v62 }
 0x22d   :  { %1145 = vmatmul.bf16.gmra.mxu2 %v702_v45  ;;  %1164 = vmatmul.bf16.gmra.mxu3 %v703_v48 }
 0x22e   :  { %v688_v51 = vmax.f32 %v573_v49, 0.0  ;;  %v689_v52 = vmax.f32 %v592_v50, 0.0 }
 0x230   :  { %v700_v53 = vpack.c.bf16 %v688_v51, %v682_v46  ;;  %v701_v0 = vpack.c.bf16 %v689_v52, %v683_v47 }
 0x232   :  { %1107 = vmatmul.bf16.gmra.mxu0 %v700_v53  ;;  %1126 = vmatmul.bf16.gmra.mxu1 %v701_v0 }
 0x233   :  { %v641_v4 = vpop.f32.mrf.mxu2  ;;  %v660_v55 = vpop.f32.mrf.mxu3 }
 0x234   :  { %v642_v58 = vadd.f32 %v641_v4, %v308_v56  ;;  %v661_v54 = vadd.f32 %v660_v55, %v309_v57 }
 0x236   :  { %v674_v8 = vmax.f32 %v642_v58, 0.0  ;;  %v675_v12 = vmax.f32 %v661_v54, 0.0 }
 0x23b   :  { %v643_v59 = vpop.f32.mrf.mxu2  ;;  %v662_v62 = vpop.f32.mrf.mxu3 }
 0x23c   :  { %v644_v60 = vadd.f32 %v643_v59, %v308_v56  ;;  %v663_v61 = vadd.f32 %v662_v62, %v309_v57 }
 0x23d   :  { %1675 = vmatmul.msk.f32.vlgmr.msrb.gmra.mxu2 %vm131_vm4, %v1944_v36  ;;  %1676 = vmatmul.msk.f32.vlgmr.msrb.gmra.mxu3 %vm131_vm4, %v1942_v35 }
 0x23e   :  { %v680_v63 = vmax.f32 %v644_v60, 0.0  ;;  %v681_v1 = vmax.f32 %v663_v61, 0.0 }
 0x240   :  { %v698_v2 = vpack.c.bf16 %v680_v63, %v674_v8  ;;  %v699_v3 = vpack.c.bf16 %v681_v1, %v675_v12 }
 0x242   :  { %1178 = vmatmul.bf16.vlgmr.msrb.gmra.mxu0 %v698_v2  ;;  %1197 = vmatmul.bf16.vlgmr.msrb.gmra.mxu1 %v699_v3 }
 0x243   :  { %v646_v41 = vpop.f32.mrf.mxu2  ;;  %v665_v5 = vpop.f32.mrf.mxu3 }
 0x244   :  { %v647_v6 = vadd.f32 %v646_v41, %v308_v56  ;;  %v666_v7 = vadd.f32 %v665_v5, %v309_v57 }
 0x246   :  { %v686_v36 = vmax.f32 %v647_v6, 0.0  ;;  %v687_v14 = vmax.f32 %v666_v7, 0.0 }
 0x24b   :  { %v648_v9 = vpop.f32.mrf.mxu2  ;;  %v667_v10 = vpop.f32.mrf.mxu3 }
 0x24c   :  { %v649_v11 = vadd.f32 %v648_v9, %v308_v56  ;;  %v668_v13 = vadd.f32 %v667_v10, %v309_v57 }
 0x24e   :  { %v692_v15 = vmax.f32 %v649_v11, 0.0  ;;  %v693_v35 = vmax.f32 %v668_v13, 0.0 }
 0x250   :  { %v704_v16 = vpack.c.bf16 %v692_v15, %v686_v36  ;;  %v705_v17 = vpack.c.bf16 %v693_v35, %v687_v14 }
 0x252   :  { %1183 = vmatmul.bf16.gmra.mxu0 %v704_v16  ;;  %1202 = vmatmul.bf16.gmra.mxu1 %v705_v17 }
 0x262   :  { %1673 = vmatmul.msk.f32.vlgmr.msra.gmra.mxu0 %vm131_vm4, %v1936_v20  ;;  %1674 = vmatmul.msk.f32.vlgmr.msra.gmra.mxu1 %vm131_vm4, %v1938_v28  ;;  %v1791_v20 = vld [vmem:[%s2056_s7] ss:$0 sm:$0xff] }
 0x29f   :  { %v1103_v18 = vpop.f32.mrf.mxu0  ;;  %v1122_v19 = vpop.f32.mrf.mxu1 }
 0x2a0   :  { %v1141_v23 = vpop.f32.mrf.mxu2  ;;  %v1160_v26 = vpop.f32.mrf.mxu3  ;;  %v1104_v45 = vadd.f32 %v1791_v20, %v1103_v18 }
 0x2a2   :  { %v1123_v51 = vadd.f32 %v1122_v19, %v1104_v45 }
 0x2a4   :  { %v1142_v57 = vadd.f32 %v1141_v23, %v1123_v51 }
 0x2a6   :  { %v1161_v61 = vadd.f32 %v1160_v26, %v1142_v57 }
 0x2a7   :  { %v1105_v21 = vpop.f32.mrf.mxu0  ;;  %v1124_v22 = vpop.f32.mrf.mxu1 }
 0x2a8   :  { %v1143_v27 = vpop.f32.mrf.mxu2  ;;  %v1162_v31 = vpop.f32.mrf.mxu3  ;;  %v1106_v48 = vadd.f32 %v1791_v20, %v1105_v21 }
 0x2aa   :  { %v1125_v52 = vadd.f32 %v1124_v22, %v1106_v48 }
 0x2ac   :  { %v1144_v58 = vadd.f32 %v1143_v27, %v1125_v52 }
 0x2ae   :  { %v1163_v8 = vadd.f32 %v1162_v31, %v1144_v58 }
 0x2af   :  { %v1108_v24 = vpop.f32.mrf.mxu0  ;;  %v1127_v25 = vpop.f32.mrf.mxu1 }
 0x2b0   :  { %v1146_v32 = vpop.f32.mrf.mxu2  ;;  %v1109_v28 = vadd.f32 %v1791_v20, %v1108_v24  ;;  %v1165_v38 = vpop.f32.mrf.mxu3 }
 0x2b2   :  { %v1128_v37 = vadd.f32 %v1127_v25, %v1109_v28 }
 0x2b4   :  { %v1147_v43 = vadd.f32 %v1146_v32, %v1128_v37 }
 0x2b6   :  { %v1166_v49 = vadd.f32 %v1165_v38, %v1147_v43 }
 0x2b7   :  { %v1110_v29 = vpop.f32.mrf.mxu0  ;;  %v1129_v30 = vpop.f32.mrf.mxu1 }
 0x2b8   :  { %v1148_v42 = vpop.f32.mrf.mxu2  ;;  %v1111_v44 = vadd.f32 %v1791_v20, %v1110_v29  ;;  %v1167_v0 = vpop.f32.mrf.mxu3 }
 0x2ba   :  { %v1130_v50 = vadd.f32 %v1129_v30, %v1111_v44 }
 0x2bc   :  { %v1149_v4 = vadd.f32 %v1148_v42, %v1130_v50 }
 0x2be   :  { %v1168_v59 = vadd.f32 %v1167_v0, %v1149_v4 }
 0x2bf   :  { %v1179_v33 = vpop.f32.mrf.mxu0  ;;  %v1198_v34 = vpop.f32.mrf.mxu1 }
 0x2c0   :  { %v1245_v56 = vpop.f32.mrf.mxu2  ;;  %v1180_v63 = vadd.f32 %v1179_v33, %v1161_v61  ;;  %v1248_v3 = vpop.f32.mrf.mxu3 }
 0x2c2   :  { %v1199_v5 = vadd.f32 %v1198_v34, %v1180_v63 }
 0x2c7   :  { %v1181_v39 = vpop.f32.mrf.mxu0  ;;  %v1200_v40 = vpop.f32.mrf.mxu1 }
 0x2c8   :  { %v1182_v1 = vadd.f32 %v1181_v39, %v1163_v8 }
 0x2ca   :  { %v1201_v6 = vadd.f32 %v1200_v40, %v1182_v1 }
 0x2cf   :  { %v1184_v46 = vpop.f32.mrf.mxu0  ;;  %v1203_v47 = vpop.f32.mrf.mxu1 }
 0x2d0   :  { %v1185_v53 = vadd.f32 %v1184_v46, %v1166_v49 }
 0x2d2   :  { %v1204_v55 = vadd.f32 %v1203_v47, %v1185_v53 }
 0x2d4   :  { %v1253_v54 = vadd.f32 %v1245_v56, %v1204_v55 }
 0x2d6   :  { %1257 = vst [vmem:[%s2057_s8 + $0x10] sm:$0xff] %v1253_v54 }
 0x2d7   :  { %v1186_v62 = vpop.f32.mrf.mxu0  ;;  %v1205_v60 = vpop.f32.mrf.mxu1 }
 0x2d8   :  { %v1187_v12 = vadd.f32 %v1186_v62, %v1168_v59 }
 0x2da   :  { %v1206_v2 = vadd.f32 %v1205_v60, %v1187_v12 }
 0x2dc   :  { %v1254_v41 = vadd.f32 %v1248_v3, %v1206_v2 }
 0x2de   :  { %1258 = vst [vmem:[%s2057_s8 + $0x18] sm:$0xff] %v1254_v41 }
 0x2df   :  { %v1239_v7 = vpop.f32.mrf.mxu0  ;;  %v1242_v9 = vpop.f32.mrf.mxu1 }
 0x2e0   :  { %v1251_v10 = vadd.f32 %v1239_v7, %v1199_v5  ;;  %v1252_v11 = vadd.f32 %v1242_v9, %v1201_v6 }
 0x2e2   :  { %1255 = vst [vmem:[%s2057_s8] sm:$0xff] %v1251_v10 }
 0x2e3   :  { %1256 = vst [vmem:[%s2057_s8 + $0x8] sm:$0xff] %v1252_v11 }
 0x2e4   :  { %1263 = vsyncpa [#allocation3], 1 }
 0x2e5   :  { %1264 = vsyncpa [#allocation5], 1 }

</bundles_post_ra>
